<compile_context>
chip_gen: v7x
topology: tpu7x:2x2x1
jax: 0.10.0
libtpu: 0.0.40
codegen_flags: <defaults>
</compile_context>

<pallas_src>
import functools

import jax
import jax.numpy as jnp
from jax.experimental import pallas as pl
from jax.experimental.pallas import tpu as pltpu


# ----------------------------------------------------------------------------
# Kernel 1 (forward):  a1 = relu(norm1(x));  a3 = relu(norm2(a1 @ W1^T))
# Operates on row tiles of the pixel-flattened (M, C) activations.
# Both a1 and a3 are emitted (needed by the LRP backward pass) in the MXU
# dtype (bf16 on the fast path) to halve inter-kernel HBM traffic.
# ----------------------------------------------------------------------------
def _fwd_fused_kernel(x_ref, sc1_ref, sh1_ref, w1_ref, sc2_ref, sh2_ref,
                      a1_ref, a3_ref):
    a1 = jnp.maximum(x_ref[...] * sc1_ref[...] + sh1_ref[...], 0.0)
    a1_ref[...] = a1.astype(a1_ref.dtype)
    z = jnp.dot(a1.astype(w1_ref.dtype), w1_ref[...],
                preferred_element_type=jnp.float32)
    a3_ref[...] = jnp.maximum(z * sc2_ref[...] + sh2_ref[...],
                              0.0).astype(a3_ref.dtype)


# ----------------------------------------------------------------------------
# 'same' 3x3 conv on a zero-padded, flattened (h*W+w)-ordered image held in a
# VMEM scratch.  Only the 3 dy-aligned row windows are loaded; the dx = +/-1
# taps are derived with pltpu.roll (XLU) and masked with the pre-built,
# pre-broadcast width-wrap masks.
#   pad_ref: (PAD + HW + PAD, Ci) f32 scratch;  w_ref: (3, 3, Ci, Co) HWIO.
# Returns the (HW, Co) f32 output.
# ----------------------------------------------------------------------------
def _conv3x3_same_flat(pad_ref, w_ref, W, HW, PAD, left_ok, right_ok):
    ci, co = w_ref.shape[2], w_ref.shape[3]
    wdt = w_ref.dtype
    lm = jnp.broadcast_to(left_ok, (HW, ci))     # broadcast once per conv
    rm = jnp.broadcast_to(right_ok, (HW, ci))
    acc = jnp.zeros((HW, co), jnp.float32)
    for dy in range(3):
        base = PAD + (dy - 1) * W                # sublane-aligned when W%8==0
        mid = pad_ref[base:base + HW, :]         # one aligned load, reused 3x
        # roll(x,1)[i] = x[i-1]  -> left neighbour (dx=0 tap of the kernel)
        left = jnp.where(lm, pltpu.roll(mid, shift=1, axis=0), 0.0)
        # roll(x,HW-1)[i] = x[i+1] -> right neighbour; wrap rows are masked
        right = jnp.where(rm, pltpu.roll(mid, shift=HW - 1, axis=0), 0.0)
        acc = acc + jnp.dot(left.astype(wdt), w_ref[dy, 0],
                            preferred_element_type=jnp.float32)
        acc = acc + jnp.dot(mid.astype(wdt), w_ref[dy, 1],
                            preferred_element_type=jnp.float32)
        acc = acc + jnp.dot(right.astype(wdt), w_ref[dy, 2],
                            preferred_element_type=jnp.float32)
    return acc


# ----------------------------------------------------------------------------
# Kernel 2 (LRP backward), one image per grid step, all-2-D I/O:
#   z2 = conv3x3(a3, W2+)           s2 = r_new * 1/(z2 + eps)
#   c2 = conv3x3(s2, flip(W2+)^T)   r3 = a3 * c2          (stays in VMEM)
#   z1 = a1 @ W1+^T                 s1 = r3 * 1/(z1 + eps)
#   c1 = s1 @ W1+                   out = r_in + a1 * c1
# ----------------------------------------------------------------------------
def _lrp_bwd_fused_kernel(a1_ref, a3_ref, rnew_ref, rin_ref,
                          w2f_ref, w2b_ref, w1pT_ref, w1p_ref,
                          out_ref, a3pad_ref, s2pad_ref, *, W, eps, approx):
    HW, Cmid = a3_ref.shape
    Cg = rnew_ref.shape[1]
    PAD = (a3pad_ref.shape[0] - HW) // 2   # invariant: PAD >= W (do not shrink)

    # Width-wrap masks, built once per kernel (hoisted out of the tap loop).
    w_col = jax.lax.broadcasted_iota(jnp.int32, (HW, 1), 0) % W
    left_ok = w_col > 0            # dx = -1 taps valid
    right_ok = w_col < W - 1       # dx = +1 taps valid

    # ---- z2 = conv3x3(a3, W2+) ; s2 = r_new / (z2 + eps) --------------------
    a3f = a3_ref[...].astype(jnp.float32)
    a3pad_ref[0:PAD, :] = jnp.zeros((PAD, Cmid), jnp.float32)
    a3pad_ref[PAD + HW:PAD + HW + PAD, :] = jnp.zeros((PAD, Cmid), jnp.float32)
    a3pad_ref[PAD:PAD + HW, :] = a3f

    z2 = _conv3x3_same_flat(a3pad_ref, w2f_ref, W, HW, PAD, left_ok, right_ok)
    s2 = rnew_ref[...] * pl.reciprocal(z2 + eps, approx=approx)

    # ---- c2 = conv3x3(s2, flip(W2+)^T) ; r3 = a3 * c2 -----------------------
    s2pad_ref[0:PAD, :] = jnp.zeros((PAD, Cg), jnp.float32)
    s2pad_ref[PAD + HW:PAD + HW + PAD, :] = jnp.zeros((PAD, Cg), jnp.float32)
    s2pad_ref[PAD:PAD + HW, :] = s2

    c2 = _conv3x3_same_flat(s2pad_ref, w2b_ref, W, HW, PAD, left_ok, right_ok)
    r3 = a3f * c2

    # ---- LRP through conv1 (1x1) + final r_input add (fused epilogue) -------
    a1 = a1_ref[...]
    z1 = jnp.dot(a1, w1pT_ref[...], preferred_element_type=jnp.float32)
    s1 = r3 * pl.reciprocal(z1 + eps, approx=approx)
    c1 = jnp.dot(s1.astype(w1p_ref.dtype), w1p_ref[...],
                 preferred_element_type=jnp.float32)
    out_ref[...] = rin_ref[...] + a1.astype(jnp.float32) * c1


# ----------------------------------------------------------------------------
# RelevancePropagationDenseLayer.forward equivalent
# ----------------------------------------------------------------------------
@functools.partial(jax.jit,
                   static_argnames=("eps", "bn_eps", "mxu_dtype", "approx_recip"))
def lrp_dense_layer(a_nchw, r_nchw, params, eps=1e-5, bn_eps=1e-5,
                    mxu_dtype=jnp.bfloat16, approx_recip=True):
    """a_nchw: (N, Cin, H, W); r_nchw: (N, Cin + growth, H, W) -> (N, Cin, H, W)."""
    a = jnp.transpose(a_nchw, (0, 2, 3, 1)).astype(jnp.float32)   # NHWC
    r = jnp.transpose(r_nchw, (0, 2, 3, 1)).astype(jnp.float32)   # NHWC
    N, H, W, Cin = a.shape
    HW = H * W
    M = N * HW

    w1mat = params["w1"][:, :, 0, 0].astype(jnp.float32)          # (Cmid, Cin)
    w2 = params["w2"].astype(jnp.float32)                         # (Cg, Cmid, 3, 3)
    Cmid, Cg = w1mat.shape[0], w2.shape[0]

    # eval-mode BatchNorm folded to per-channel scale/shift
    g1, b1, m1, v1 = params["bn1"]
    g2, b2, m2, v2 = params["bn2"]
    sc1 = (g1 / jnp.sqrt(v1 + bn_eps)).astype(jnp.float32)
    sh1 = (b1 - m1 * sc1).astype(jnp.float32)
    sc2 = (g2 / jnp.sqrt(v2 + bn_eps)).astype(jnp.float32)
    sh2 = (b2 - m2 * sc2).astype(jnp.float32)

    # weight layouts (once): forward 1x1, clamped z+ variants, flipped/IO-swapped
    # clamped 3x3 kernel for the gradient conv.
    w1_fwd = w1mat.T.astype(mxu_dtype)                            # (Cin, Cmid)
    w1p = jnp.clip(w1mat, 0.0, None)                              # (Cmid, Cin)
    w1pT_q, w1p_q = w1p.T.astype(mxu_dtype), w1p.astype(mxu_dtype)
    w2p = jnp.clip(w2, 0.0, None)
    w2f = jnp.transpose(w2p, (2, 3, 1, 0))                        # (3,3,Cmid,Cg)
    w2b = jnp.transpose(w2f[::-1, ::-1], (0, 1, 3, 2))            # (3,3,Cg,Cmid)
    w2f_q, w2b_q = w2f.astype(mxu_dtype), w2b.astype(mxu_dtype)

    cp = lambda: pltpu.CompilerParams(dimension_semantics=("parallel",),
                                      vmem_limit_bytes=48 * 1024 * 1024)
    row = lambda i: (i, 0)
    rep2 = lambda i: (0, 0)
    rep4 = lambda i: (0, 0, 0, 0)

    # ---- forward: a1 = relu1(norm1(a)), a3 = relu2(norm2(conv1(a1))) --------
    tm = min(M, 1024)
    a1_2d, a3_2d = pl.pallas_call(
        _fwd_fused_kernel,
        out_shape=(jax.ShapeDtypeStruct((M, Cin), mxu_dtype),
                   jax.ShapeDtypeStruct((M, Cmid), mxu_dtype)),
        grid=(pl.cdiv(M, tm),),
        in_specs=[pl.BlockSpec((tm, Cin), row),
                  pl.BlockSpec((1, Cin), rep2),
                  pl.BlockSpec((1, Cin), rep2),
                  pl.BlockSpec((Cin, Cmid), rep2),
                  pl.BlockSpec((1, Cmid), rep2),
                  pl.BlockSpec((1, Cmid), rep2)],
        out_specs=(pl.BlockSpec((tm, Cin), row),
                   pl.BlockSpec((tm, Cmid), row)),
        compiler_params=cp(),
    )(a.reshape(M, Cin), sc1.reshape(1, Cin), sh1.reshape(1, Cin),
      w1_fwd, sc2.reshape(1, Cmid), sh2.reshape(1, Cmid))

    # ---- LRP backward (conv2 3x3 pair + conv1 1x1 pair + add, all fused) ----
    PAD = -(-(W + 1) // 8) * 8              # aligned guard rows, PAD >= W + 1
    rin_2d = r[..., :Cin].reshape(M, Cin)
    rnew_2d = r[..., Cin:].reshape(M, Cg)

    out2d = pl.pallas_call(
        functools.partial(_lrp_bwd_fused_kernel, W=W, eps=eps,
                          approx=approx_recip),
        out_shape=jax.ShapeDtypeStruct((M, Cin), jnp.float32),
        grid=(N,),
        in_specs=[pl.BlockSpec((HW, Cin), row),        # a1   (per-image slab)
                  pl.BlockSpec((HW, Cmid), row),       # a3
                  pl.BlockSpec((HW, Cg), row),         # r_new
                  pl.BlockSpec((HW, Cin), row),        # r_input
                  pl.BlockSpec((3, 3, Cmid, Cg), rep4),   # resident weights
                  pl.BlockSpec((3, 3, Cg, Cmid), rep4),
                  pl.BlockSpec((Cin, Cmid), rep2),
                  pl.BlockSpec((Cmid, Cin), rep2)],
        out_specs=pl.BlockSpec((HW, Cin), row),
        scratch_shapes=[pltpu.VMEM((HW + 2 * PAD, Cmid), jnp.float32),
                        pltpu.VMEM((HW + 2 * PAD, Cg), jnp.float32)],
        compiler_params=cp(),
    )(a1_2d, a3_2d, rnew_2d, rin_2d, w2f_q, w2b_q, w1pT_q, w1p_q)

    return jnp.transpose(out2d.reshape(N, H, W, Cin), (0, 3, 1, 2))   # NCHW


# ----------------------------------------------------------------------------
# Pure-JAX reference (mirrors the PyTorch module, via jax.vjp for the conv grad)
# ----------------------------------------------------------------------------
def _ref_lrp(a, r, params, eps=1e-5, bn_eps=1e-5):
    prec = jax.lax.Precision.HIGHEST

    def bn(x, g, b, m, v):
        s = g / jnp.sqrt(v + bn_eps)
        return x * s[None, :, None, None] + (b - m * s)[None, :, None, None]

    def conv(x, w, pad):
        return jax.lax.conv_general_dilated(
            x, w, (1, 1), [(pad, pad), (pad, pad)],
            dimension_numbers=("NCHW", "OIHW", "NCHW"), precision=prec)

    a1 = jax.nn.relu(bn(a, *params["bn1"]))
    a2c = conv(a1, params["w1"], 0)
    a3 = jax.nn.relu(bn(a2c, *params["bn2"]))

    Cin = a.shape[1]
    r_input, r_new = r[:, :Cin], r[:, Cin:]

    def lrp_conv(act, rel, w, pad):
        zfn = lambda x: conv(x, w, pad) + eps
        z, vjp = jax.vjp(zfn, act)
        (c,) = vjp(rel / z)
        return act * c

    r_out = lrp_conv(a3, r_new, jnp.clip(params["w2"], 0.0, None), 1)
    r_out = lrp_conv(a1, r_out, jnp.clip(params["w1"], 0.0, None), 0)
    return r_input + r_out


# ----------------------------------------------------------------------------
if __name__ == "__main__":
    key = jax.random.PRNGKey(0)
    ks = jax.random.split(key, 12)

    N, H, W = 2, 8, 8
    Cin, Cmid, Cg = 16, 32, 8      # input / bottleneck / growth-rate channels

    params = {
        "w1": 0.2 * jax.random.normal(ks[0], (Cmid, Cin, 1, 1), jnp.float32),
        "w2": 0.2 * jax.random.normal(ks[1], (Cg, Cmid, 3, 3), jnp.float32),
        "bn1": (
            jax.random.uniform(ks[2], (Cin,), jnp.float32, 0.5, 1.5),   # gamma
            0.3 + 0.1 * jax.random.normal(ks[3], (Cin,), jnp.float32),  # beta
            0.1 * jax.random.normal(ks[4], (Cin,), jnp.float32),        # running_mean
            jax.random.uniform(ks[5], (Cin,), jnp.float32, 0.5, 1.5),   # running_var
        ),
        "bn2": (
            jax.random.uniform(ks[6], (Cmid,), jnp.float32, 0.5, 1.5),
            0.3 + 0.1 * jax.random.normal(ks[7], (Cmid,), jnp.float32),
            0.1 * jax.random.normal(ks[8], (Cmid,), jnp.float32),
            jax.random.uniform(ks[9], (Cmid,), jnp.float32, 0.5, 1.5),
        ),
    }

    # inputs: activations a (NCHW) and upstream relevance r over [Cin + growth]
    a = jax.random.normal(ks[10], (N, Cin, H, W), jnp.float32)
    r = jax.random.uniform(ks[11], (N, Cin + Cg, H, W), jnp.float32)

    # fast path (bf16 MXU + bf16 intermediates + approx EUP reciprocal)
    out_fast = jax.block_until_ready(lrp_dense_layer(a, r, params))
    # accurate path (f32 everywhere, exact reciprocal)
    out_acc = jax.block_until_ready(
        lrp_dense_layer(a, r, params, mxu_dtype=jnp.float32,
                        approx_recip=False))
    ref = jax.block_until_ready(_ref_lrp(a, r, params))

    assert out_fast.shape == a.shape and out_acc.shape == a.shape
    scale = float(jnp.max(jnp.abs(ref))) + 1e-8
    err_acc = float(jnp.max(jnp.abs(out_acc - ref))) / scale
    err_fast = float(jnp.max(jnp.abs(out_fast - ref))) / scale
    assert err_acc < 5e-3, f"f32 path mismatch vs reference: {err_acc}"
    assert err_fast < 5e-2, f"bf16 fast path mismatch vs reference: {err_fast}"
    print("KERNEL_OK")
</pallas_src>

<mosaic_0001>
module attributes {stable_mosaic.version = 11 : i64} {
  func.func @_fwd_fused_kernel(%arg0: i32, %arg1: memref<128x16xf32, #tpu.memory_space<vmem>>, %arg2: memref<1x16xf32, #tpu.memory_space<vmem>>, %arg3: memref<1x16xf32, #tpu.memory_space<vmem>>, %arg4: memref<16x32xbf16, #tpu.memory_space<vmem>>, %arg5: memref<1x32xf32, #tpu.memory_space<vmem>>, %arg6: memref<1x32xf32, #tpu.memory_space<vmem>>, %arg7: memref<128x16xbf16, #tpu.memory_space<vmem>>, %arg8: memref<128x32xbf16, #tpu.memory_space<vmem>>) attributes {dimension_semantics = [#tpu.dimension_semantics<parallel>], iteration_bounds = array<i64: 1>, scalar_prefetch = 0 : i64, scratch_operands = 0 : i64, tpu.core_type = #tpu.core_type<tc>, window_params = [{transform_indices = @transform_0, window_bounds = array<i64: 128, 16>}, {pipeline_mode = #tpu.pipeline_mode<synchronous>, transform_indices = @transform_1, window_bounds = array<i64: 1, 16>}, {pipeline_mode = #tpu.pipeline_mode<synchronous>, transform_indices = @transform_2, window_bounds = array<i64: 1, 16>}, {pipeline_mode = #tpu.pipeline_mode<synchronous>, transform_indices = @transform_3, window_bounds = array<i64: 16, 32>}, {pipeline_mode = #tpu.pipeline_mode<synchronous>, transform_indices = @transform_4, window_bounds = array<i64: 1, 32>}, {pipeline_mode = #tpu.pipeline_mode<synchronous>, transform_indices = @transform_5, window_bounds = array<i64: 1, 32>}, {transform_indices = @transform_6, window_bounds = array<i64: 128, 16>}, {transform_indices = @transform_7, window_bounds = array<i64: 128, 32>}]} {
    %c0 = arith.constant 0 : index
    %c0_0 = arith.constant 0 : index
    %0 = vector.load %arg1[%c0, %c0_0] : memref<128x16xf32, #tpu.memory_space<vmem>>, vector<128x16xf32>
    %c0_1 = arith.constant 0 : index
    %c0_2 = arith.constant 0 : index
    %1 = vector.load %arg2[%c0_1, %c0_2] : memref<1x16xf32, #tpu.memory_space<vmem>>, vector<1x16xf32>
    %2 = vector.broadcast %1 : vector<1x16xf32> to vector<128x16xf32>
    %3 = arith.mulf %0, %2 : vector<128x16xf32>
    %c0_3 = arith.constant 0 : index
    %c0_4 = arith.constant 0 : index
    %4 = vector.load %arg3[%c0_3, %c0_4] : memref<1x16xf32, #tpu.memory_space<vmem>>, vector<1x16xf32>
    %5 = vector.broadcast %4 : vector<1x16xf32> to vector<128x16xf32>
    %6 = arith.addf %3, %5 : vector<128x16xf32>
    %cst = arith.constant 0.000000e+00 : f32
    %7 = vector.broadcast %cst : f32 to vector<128x16xf32>
    %8 = arith.maximumf %6, %7 : vector<128x16xf32>
    %9 = arith.truncf %8 : vector<128x16xf32> to vector<128x16xbf16>
    %c0_5 = arith.constant 0 : index
    %c0_6 = arith.constant 0 : index
    %10 = vector.load %arg7[%c0_5, %c0_6] : memref<128x16xbf16, #tpu.memory_space<vmem>>, vector<128x16xbf16>
    tpu.vector_store %arg7[%c0_5, %c0_6], %9 {strides = array<i32>} : memref<128x16xbf16, #tpu.memory_space<vmem>>, vector<128x16xbf16>,
    %11 = arith.truncf %8 : vector<128x16xf32> to vector<128x16xbf16>
    %c0_7 = arith.constant 0 : index
    %c0_8 = arith.constant 0 : index
    %12 = vector.load %arg4[%c0_7, %c0_8] : memref<16x32xbf16, #tpu.memory_space<vmem>>, vector<16x32xbf16>
    %cst_9 = arith.constant dense<0.000000e+00> : vector<128x32xf32>
    %13 = tpu.matmul %11, %12, %cst_9 {dimension_numbers = #tpu.dot_dimension_numbers<[1], [0], [0], [1], [0, 0, 1, 1], [], []>} : vector<128x16xbf16>, vector<16x32xbf16>, vector<128x32xf32> -> vector<128x32xf32>
    %c0_10 = arith.constant 0 : index
    %c0_11 = arith.constant 0 : index
    %14 = vector.load %arg5[%c0_10, %c0_11] : memref<1x32xf32, #tpu.memory_space<vmem>>, vector<1x32xf32>
    %15 = vector.broadcast %14 : vector<1x32xf32> to vector<128x32xf32>
    %16 = arith.mulf %13, %15 : vector<128x32xf32>
    %c0_12 = arith.constant 0 : index
    %c0_13 = arith.constant 0 : index
    %17 = vector.load %arg6[%c0_12, %c0_13] : memref<1x32xf32, #tpu.memory_space<vmem>>, vector<1x32xf32>
    %18 = vector.broadcast %17 : vector<1x32xf32> to vector<128x32xf32>
    %19 = arith.addf %16, %18 : vector<128x32xf32>
    %cst_14 = arith.constant 0.000000e+00 : f32
    %20 = vector.broadcast %cst_14 : f32 to vector<128x32xf32>
    %21 = arith.maximumf %19, %20 : vector<128x32xf32>
    %22 = arith.truncf %21 : vector<128x32xf32> to vector<128x32xbf16>
    %c0_15 = arith.constant 0 : index
    %c0_16 = arith.constant 0 : index
    %23 = vector.load %arg8[%c0_15, %c0_16] : memref<128x32xbf16, #tpu.memory_space<vmem>>, vector<128x32xbf16>
    tpu.vector_store %arg8[%c0_15, %c0_16], %22 {strides = array<i32>} : memref<128x32xbf16, #tpu.memory_space<vmem>>, vector<128x32xbf16>,
    return
  }
  func.func @transform_0(%arg0: i32) -> (i32, i32) {
    %c0_i32 = arith.constant 0 : i32
    %c0_i32_0 = arith.constant 0 : i32
    return %arg0, %c0_i32 : i32, i32
  }
  func.func @transform_1(%arg0: i32) -> (i32, i32) {
    %c0_i32 = arith.constant 0 : i32
    %c0_i32_0 = arith.constant 0 : i32
    %c0_i32_1 = arith.constant 0 : i32
    return %c0_i32, %c0_i32_0 : i32, i32
  }
  func.func @transform_2(%arg0: i32) -> (i32, i32) {
    %c0_i32 = arith.constant 0 : i32
    %c0_i32_0 = arith.constant 0 : i32
    %c0_i32_1 = arith.constant 0 : i32
    return %c0_i32, %c0_i32_0 : i32, i32
  }
  func.func @transform_3(%arg0: i32) -> (i32, i32) {
    %c0_i32 = arith.constant 0 : i32
    %c0_i32_0 = arith.constant 0 : i32
    %c0_i32_1 = arith.constant 0 : i32
    return %c0_i32, %c0_i32_0 : i32, i32
  }
  func.func @transform_4(%arg0: i32) -> (i32, i32) {
    %c0_i32 = arith.constant 0 : i32
    %c0_i32_0 = arith.constant 0 : i32
    %c0_i32_1 = arith.constant 0 : i32
    return %c0_i32, %c0_i32_0 : i32, i32
  }
  func.func @transform_5(%arg0: i32) -> (i32, i32) {
    %c0_i32 = arith.constant 0 : i32
    %c0_i32_0 = arith.constant 0 : i32
    %c0_i32_1 = arith.constant 0 : i32
    return %c0_i32, %c0_i32_0 : i32, i32
  }
  func.func @transform_6(%arg0: i32) -> (i32, i32) {
    %c0_i32 = arith.constant 0 : i32
    %c0_i32_0 = arith.constant 0 : i32
    return %arg0, %c0_i32 : i32, i32
  }
  func.func @transform_7(%arg0: i32) -> (i32, i32) {
    %c0_i32 = arith.constant 0 : i32
    %c0_i32_0 = arith.constant 0 : i32
    return %arg0, %c0_i32 : i32, i32
  }
}

module attributes {stable_mosaic.version = 11 : i64} {
  func.func @_lrp_bwd_fused_kernel(%arg0: i32, %arg1: memref<64x16xbf16, #tpu.memory_space<vmem>>, %arg2: memref<64x32xbf16, #tpu.memory_space<vmem>>, %arg3: memref<64x8xf32, #tpu.memory_space<vmem>>, %arg4: memref<64x16xf32, #tpu.memory_space<vmem>>, %arg5: memref<3x3x32x8xbf16, #tpu.memory_space<vmem>>, %arg6: memref<3x3x8x32xbf16, #tpu.memory_space<vmem>>, %arg7: memref<16x32xbf16, #tpu.memory_space<vmem>>, %arg8: memref<32x16xbf16, #tpu.memory_space<vmem>>, %arg9: memref<64x16xf32, #tpu.memory_space<vmem>>, %arg10: memref<96x32xf32, #tpu.memory_space<vmem>>, %arg11: memref<96x8xf32, #tpu.memory_space<vmem>>) attributes {dimension_semantics = [#tpu.dimension_semantics<parallel>], iteration_bounds = array<i64: 2>, scalar_prefetch = 0 : i64, scratch_operands = 2 : i64, tpu.core_type = #tpu.core_type<tc>, window_params = [{transform_indices = @transform_0, window_bounds = array<i64: 64, 16>}, {transform_indices = @transform_1, window_bounds = array<i64: 64, 32>}, {transform_indices = @transform_2, window_bounds = array<i64: 64, 8>}, {transform_indices = @transform_3, window_bounds = array<i64: 64, 16>}, {pipeline_mode = #tpu.pipeline_mode<synchronous>, transform_indices = @transform_4, window_bounds = array<i64: 3, 3, 32, 8>}, {pipeline_mode = #tpu.pipeline_mode<synchronous>, transform_indices = @transform_5, window_bounds = array<i64: 3, 3, 8, 32>}, {pipeline_mode = #tpu.pipeline_mode<synchronous>, transform_indices = @transform_6, window_bounds = array<i64: 16, 32>}, {pipeline_mode = #tpu.pipeline_mode<synchronous>, transform_indices = @transform_7, window_bounds = array<i64: 32, 16>}, {transform_indices = @transform_8, window_bounds = array<i64: 64, 16>}]} {
    %0 = tpu.iota {dimensions = array<i32: 0>} : vector<64x1xi32>
    %c8_i32 = arith.constant 8 : i32
    %c0_i32 = arith.constant 0 : i32
    %1 = arith.cmpi eq, %c8_i32, %c0_i32 : i32
    %c1_i32 = arith.constant 1 : i32
    %2 = arith.select %1, %c1_i32, %c8_i32 : i32
    %3 = vector.broadcast %2 : i32 to vector<64x1xi32>
    %4 = arith.remsi %0, %3 : vector<64x1xi32>
    %c0_i32_0 = arith.constant 0 : i32
    %5 = vector.broadcast %c0_i32_0 : i32 to vector<64x1xi32>
    %6 = arith.cmpi ne, %4, %5 : vector<64x1xi32>
    %c0_i32_1 = arith.constant 0 : i32
    %7 = vector.broadcast %c0_i32_1 : i32 to vector<64x1xi32>
    %8 = arith.cmpi slt, %4, %7 : vector<64x1xi32>
    %c0_i32_2 = arith.constant 0 : i32
    %9 = arith.cmpi slt, %2, %c0_i32_2 : i32
    %10 = vector.broadcast %9 : i1 to vector<64x1xi1>
    %11 = vector.broadcast %10 : vector<64x1xi1> to vector<64x1xi1>
    %12 = arith.xori %8, %11 : vector<64x1xi1>
    %13 = arith.andi %12, %6 : vector<64x1xi1>
    %14 = vector.broadcast %2 : i32 to vector<64x1xi32>
    %15 = arith.addi %4, %14 : vector<64x1xi32>
    %16 = arith.select %13, %15, %4 : vector<64x1xi1>, vector<64x1xi32>
    %c0_i32_3 = arith.constant 0 : i32
    %17 = vector.broadcast %c0_i32_3 : i32 to vector<64x1xi32>
    %18 = arith.cmpi sgt, %16, %17 : vector<64x1xi32>
    %c7_i32 = arith.constant 7 : i32
    %19 = vector.broadcast %c7_i32 : i32 to vector<64x1xi32>
    %20 = arith.cmpi slt, %16, %19 : vector<64x1xi32>
    %c0 = arith.constant 0 : index
    %c0_4 = arith.constant 0 : index
    %21 = vector.load %arg2[%c0, %c0_4] : memref<64x32xbf16, #tpu.memory_space<vmem>>, vector<64x32xbf16>
    %22 = arith.extf %21 : vector<64x32xbf16> to vector<64x32xf32>
    %cst = arith.constant 0.000000e+00 : f32
    %23 = vector.broadcast %cst : f32 to vector<16x32xf32>
    %c0_5 = arith.constant 0 : index
    %c0_6 = arith.constant 0 : index
    %24 = vector.load %arg10[%c0_5, %c0_6] : memref<96x32xf32, #tpu.memory_space<vmem>>, vector<16x32xf32>
    tpu.vector_store %arg10[%c0_5, %c0_6], %23 {strides = array<i32>} : memref<96x32xf32, #tpu.memory_space<vmem>>, vector<16x32xf32>,
    %cst_7 = arith.constant 0.000000e+00 : f32
    %25 = vector.broadcast %cst_7 : f32 to vector<16x32xf32>
    %c80 = arith.constant 80 : index
    %c0_8 = arith.constant 0 : index
    %26 = vector.load %arg10[%c80, %c0_8] : memref<96x32xf32, #tpu.memory_space<vmem>>, vector<16x32xf32>
    tpu.vector_store %arg10[%c80, %c0_8], %25 {strides = array<i32>} : memref<96x32xf32, #tpu.memory_space<vmem>>, vector<16x32xf32>,
    %c16 = arith.constant 16 : index
    %c0_9 = arith.constant 0 : index
    %27 = vector.load %arg10[%c16, %c0_9] : memref<96x32xf32, #tpu.memory_space<vmem>>, vector<64x32xf32>
    tpu.vector_store %arg10[%c16, %c0_9], %22 {strides = array<i32>} : memref<96x32xf32, #tpu.memory_space<vmem>>, vector<64x32xf32>,
    %28 = vector.shape_cast %18 : vector<64x1xi1> to vector<64x1xi1>
    %29 = vector.broadcast %28 : vector<64x1xi1> to vector<64x32xi1>
    %30 = vector.shape_cast %20 : vector<64x1xi1> to vector<64x1xi1>
    %31 = vector.broadcast %30 : vector<64x1xi1> to vector<64x32xi1>
    %cst_10 = arith.constant 0.000000e+00 : f32
    %32 = vector.broadcast %cst_10 : f32 to vector<64x8xf32>
    %c8 = arith.constant 8 : index
    %c0_11 = arith.constant 0 : index
    %33 = vector.load %arg10[%c8, %c0_11] : memref<96x32xf32, #tpu.memory_space<vmem>>, vector<64x32xf32>
    %c1_i32_12 = arith.constant 1 : i32
    %34 = tpu.dynamic_rotate %33 by %c1_i32_12 dim 0 : vector<64x32xf32>, i32 -> vector<64x32xf32>
    %cst_13 = arith.constant 0.000000e+00 : f32
    %35 = vector.broadcast %cst_13 : f32 to vector<64x32xf32>
    %36 = arith.select %29, %34, %35 : vector<64x32xi1>, vector<64x32xf32>
    %c63_i32 = arith.constant 63 : i32
    %37 = tpu.dynamic_rotate %33 by %c63_i32 dim 0 : vector<64x32xf32>, i32 -> vector<64x32xf32>
    %cst_14 = arith.constant 0.000000e+00 : f32
    %38 = vector.broadcast %cst_14 : f32 to vector<64x32xf32>
    %39 = arith.select %31, %37, %38 : vector<64x32xi1>, vector<64x32xf32>
    %40 = arith.truncf %36 : vector<64x32xf32> to vector<64x32xbf16>
    %c0_15 = arith.constant 0 : index
    %c0_16 = arith.constant 0 : index
    %c0_17 = arith.constant 0 : index
    %c0_18 = arith.constant 0 : index
    %41 = vector.load %arg5[%c0_15, %c0_16, %c0_17, %c0_18] : memref<3x3x32x8xbf16, #tpu.memory_space<vmem>>, vector<1x1x32x8xbf16>
    %42 = vector.shape_cast %41 : vector<1x1x32x8xbf16> to vector<32x8xbf16>
    %cst_19 = arith.constant dense<0.000000e+00> : vector<64x8xf32>
    %43 = tpu.matmul %40, %42, %cst_19 {dimension_numbers = #tpu.dot_dimension_numbers<[1], [0], [0], [1], [0, 0, 1, 1], [], []>} : vector<64x32xbf16>, vector<32x8xbf16>, vector<64x8xf32> -> vector<64x8xf32>
    %44 = arith.addf %32, %43 : vector<64x8xf32>
    %45 = arith.truncf %33 : vector<64x32xf32> to vector<64x32xbf16>
    %c0_20 = arith.constant 0 : index
    %c1 = arith.constant 1 : index
    %c0_21 = arith.constant 0 : index
    %c0_22 = arith.constant 0 : index
    %46 = vector.load %arg5[%c0_20, %c1, %c0_21, %c0_22] : memref<3x3x32x8xbf16, #tpu.memory_space<vmem>>, vector<1x1x32x8xbf16>
    %47 = vector.shape_cast %46 : vector<1x1x32x8xbf16> to vector<32x8xbf16>
    %cst_23 = arith.constant dense<0.000000e+00> : vector<64x8xf32>
    %48 = tpu.matmul %45, %47, %cst_23 {dimension_numbers = #tpu.dot_dimension_numbers<[1], [0], [0], [1], [0, 0, 1, 1], [], []>} : vector<64x32xbf16>, vector<32x8xbf16>, vector<64x8xf32> -> vector<64x8xf32>
    %49 = arith.addf %44, %48 : vector<64x8xf32>
    %50 = arith.truncf %39 : vector<64x32xf32> to vector<64x32xbf16>
    %c0_24 = arith.constant 0 : index
    %c2 = arith.constant 2 : index
    %c0_25 = arith.constant 0 : index
    %c0_26 = arith.constant 0 : index
    %51 = vector.load %arg5[%c0_24, %c2, %c0_25, %c0_26] : memref<3x3x32x8xbf16, #tpu.memory_space<vmem>>, vector<1x1x32x8xbf16>
    %52 = vector.shape_cast %51 : vector<1x1x32x8xbf16> to vector<32x8xbf16>
    %cst_27 = arith.constant dense<0.000000e+00> : vector<64x8xf32>
    %53 = tpu.matmul %50, %52, %cst_27 {dimension_numbers = #tpu.dot_dimension_numbers<[1], [0], [0], [1], [0, 0, 1, 1], [], []>} : vector<64x32xbf16>, vector<32x8xbf16>, vector<64x8xf32> -> vector<64x8xf32>
    %54 = arith.addf %49, %53 : vector<64x8xf32>
    %c16_28 = arith.constant 16 : index
    %c0_29 = arith.constant 0 : index
    %55 = vector.load %arg10[%c16_28, %c0_29] : memref<96x32xf32, #tpu.memory_space<vmem>>, vector<64x32xf32>
    %c1_i32_30 = arith.constant 1 : i32
    %56 = tpu.dynamic_rotate %55 by %c1_i32_30 dim 0 : vector<64x32xf32>, i32 -> vector<64x32xf32>
    %cst_31 = arith.constant 0.000000e+00 : f32
    %57 = vector.broadcast %cst_31 : f32 to vector<64x32xf32>
    %58 = arith.select %29, %56, %57 : vector<64x32xi1>, vector<64x32xf32>
    %c63_i32_32 = arith.constant 63 : i32
    %59 = tpu.dynamic_rotate %55 by %c63_i32_32 dim 0 : vector<64x32xf32>, i32 -> vector<64x32xf32>
    %cst_33 = arith.constant 0.000000e+00 : f32
    %60 = vector.broadcast %cst_33 : f32 to vector<64x32xf32>
    %61 = arith.select %31, %59, %60 : vector<64x32xi1>, vector<64x32xf32>
    %62 = arith.truncf %58 : vector<64x32xf32> to vector<64x32xbf16>
    %c1_34 = arith.constant 1 : index
    %c0_35 = arith.constant 0 : index
    %c0_36 = arith.constant 0 : index
    %c0_37 = arith.constant 0 : index
    %63 = vector.load %arg5[%c1_34, %c0_35, %c0_36, %c0_37] : memref<3x3x32x8xbf16, #tpu.memory_space<vmem>>, vector<1x1x32x8xbf16>
    %64 = vector.shape_cast %63 : vector<1x1x32x8xbf16> to vector<32x8xbf16>
    %cst_38 = arith.constant dense<0.000000e+00> : vector<64x8xf32>
    %65 = tpu.matmul %62, %64, %cst_38 {dimension_numbers = #tpu.dot_dimension_numbers<[1], [0], [0], [1], [0, 0, 1, 1], [], []>} : vector<64x32xbf16>, vector<32x8xbf16>, vector<64x8xf32> -> vector<64x8xf32>
    %66 = arith.addf %54, %65 : vector<64x8xf32>
    %67 = arith.truncf %55 : vector<64x32xf32> to vector<64x32xbf16>
    %c1_39 = arith.constant 1 : index
    %c1_40 = arith.constant 1 : index
    %c0_41 = arith.constant 0 : index
    %c0_42 = arith.constant 0 : index
    %68 = vector.load %arg5[%c1_39, %c1_40, %c0_41, %c0_42] : memref<3x3x32x8xbf16, #tpu.memory_space<vmem>>, vector<1x1x32x8xbf16>
    %69 = vector.shape_cast %68 : vector<1x1x32x8xbf16> to vector<32x8xbf16>
    %cst_43 = arith.constant dense<0.000000e+00> : vector<64x8xf32>
    %70 = tpu.matmul %67, %69, %cst_43 {dimension_numbers = #tpu.dot_dimension_numbers<[1], [0], [0], [1], [0, 0, 1, 1], [], []>} : vector<64x32xbf16>, vector<32x8xbf16>, vector<64x8xf32> -> vector<64x8xf32>
    %71 = arith.addf %66, %70 : vector<64x8xf32>
    %72 = arith.truncf %61 : vector<64x32xf32> to vector<64x32xbf16>
    %c1_44 = arith.constant 1 : index
    %c2_45 = arith.constant 2 : index
    %c0_46 = arith.constant 0 : index
    %c0_47 = arith.constant 0 : index
    %73 = vector.load %arg5[%c1_44, %c2_45, %c0_46, %c0_47] : memref<3x3x32x8xbf16, #tpu.memory_space<vmem>>, vector<1x1x32x8xbf16>
    %74 = vector.shape_cast %73 : vector<1x1x32x8xbf16> to vector<32x8xbf16>
    %cst_48 = arith.constant dense<0.000000e+00> : vector<64x8xf32>
    %75 = tpu.matmul %72, %74, %cst_48 {dimension_numbers = #tpu.dot_dimension_numbers<[1], [0], [0], [1], [0, 0, 1, 1], [], []>} : vector<64x32xbf16>, vector<32x8xbf16>, vector<64x8xf32> -> vector<64x8xf32>
    %76 = arith.addf %71, %75 : vector<64x8xf32>
    %c24 = arith.constant 24 : index
    %c0_49 = arith.constant 0 : index
    %77 = vector.load %arg10[%c24, %c0_49] : memref<96x32xf32, #tpu.memory_space<vmem>>, vector<64x32xf32>
    %c1_i32_50 = arith.constant 1 : i32
    %78 = tpu.dynamic_rotate %77 by %c1_i32_50 dim 0 : vector<64x32xf32>, i32 -> vector<64x32xf32>
    %cst_51 = arith.constant 0.000000e+00 : f32
    %79 = vector.broadcast %cst_51 : f32 to vector<64x32xf32>
    %80 = arith.select %29, %78, %79 : vector<64x32xi1>, vector<64x32xf32>
    %c63_i32_52 = arith.constant 63 : i32
    %81 = tpu.dynamic_rotate %77 by %c63_i32_52 dim 0 : vector<64x32xf32>, i32 -> vector<64x32xf32>
    %cst_53 = arith.constant 0.000000e+00 : f32
    %82 = vector.broadcast %cst_53 : f32 to vector<64x32xf32>
    %83 = arith.select %31, %81, %82 : vector<64x32xi1>, vector<64x32xf32>
    %84 = arith.truncf %80 : vector<64x32xf32> to vector<64x32xbf16>
    %c2_54 = arith.constant 2 : index
    %c0_55 = arith.constant 0 : index
    %c0_56 = arith.constant 0 : index
    %c0_57 = arith.constant 0 : index
    %85 = vector.load %arg5[%c2_54, %c0_55, %c0_56, %c0_57] : memref<3x3x32x8xbf16, #tpu.memory_space<vmem>>, vector<1x1x32x8xbf16>
    %86 = vector.shape_cast %85 : vector<1x1x32x8xbf16> to vector<32x8xbf16>
    %cst_58 = arith.constant dense<0.000000e+00> : vector<64x8xf32>
    %87 = tpu.matmul %84, %86, %cst_58 {dimension_numbers = #tpu.dot_dimension_numbers<[1], [0], [0], [1], [0, 0, 1, 1], [], []>} : vector<64x32xbf16>, vector<32x8xbf16>, vector<64x8xf32> -> vector<64x8xf32>
    %88 = arith.addf %76, %87 : vector<64x8xf32>
    %89 = arith.truncf %77 : vector<64x32xf32> to vector<64x32xbf16>
    %c2_59 = arith.constant 2 : index
    %c1_60 = arith.constant 1 : index
    %c0_61 = arith.constant 0 : index
    %c0_62 = arith.constant 0 : index
    %90 = vector.load %arg5[%c2_59, %c1_60, %c0_61, %c0_62] : memref<3x3x32x8xbf16, #tpu.memory_space<vmem>>, vector<1x1x32x8xbf16>
    %91 = vector.shape_cast %90 : vector<1x1x32x8xbf16> to vector<32x8xbf16>
    %cst_63 = arith.constant dense<0.000000e+00> : vector<64x8xf32>
    %92 = tpu.matmul %89, %91, %cst_63 {dimension_numbers = #tpu.dot_dimension_numbers<[1], [0], [0], [1], [0, 0, 1, 1], [], []>} : vector<64x32xbf16>, vector<32x8xbf16>, vector<64x8xf32> -> vector<64x8xf32>
    %93 = arith.addf %88, %92 : vector<64x8xf32>
    %94 = arith.truncf %83 : vector<64x32xf32> to vector<64x32xbf16>
    %c2_64 = arith.constant 2 : index
    %c2_65 = arith.constant 2 : index
    %c0_66 = arith.constant 0 : index
    %c0_67 = arith.constant 0 : index
    %95 = vector.load %arg5[%c2_64, %c2_65, %c0_66, %c0_67] : memref<3x3x32x8xbf16, #tpu.memory_space<vmem>>, vector<1x1x32x8xbf16>
    %96 = vector.shape_cast %95 : vector<1x1x32x8xbf16> to vector<32x8xbf16>
    %cst_68 = arith.constant dense<0.000000e+00> : vector<64x8xf32>
    %97 = tpu.matmul %94, %96, %cst_68 {dimension_numbers = #tpu.dot_dimension_numbers<[1], [0], [0], [1], [0, 0, 1, 1], [], []>} : vector<64x32xbf16>, vector<32x8xbf16>, vector<64x8xf32> -> vector<64x8xf32>
    %98 = arith.addf %93, %97 : vector<64x8xf32>
    %c0_69 = arith.constant 0 : index
    %c0_70 = arith.constant 0 : index
    %99 = vector.load %arg3[%c0_69, %c0_70] : memref<64x8xf32, #tpu.memory_space<vmem>>, vector<64x8xf32>
    %cst_71 = arith.constant 9.99999974E-6 : f32
    %100 = vector.broadcast %cst_71 : f32 to vector<64x8xf32>
    %101 = arith.addf %98, %100 : vector<64x8xf32>
    %102 = tpu.reciprocal %101 {approx = true} : vector<64x8xf32> -> vector<64x8xf32>
    %103 = arith.mulf %99, %102 : vector<64x8xf32>
    %cst_72 = arith.constant 0.000000e+00 : f32
    %104 = vector.broadcast %cst_72 : f32 to vector<16x8xf32>
    %c0_73 = arith.constant 0 : index
    %c0_74 = arith.constant 0 : index
    %105 = vector.load %arg11[%c0_73, %c0_74] : memref<96x8xf32, #tpu.memory_space<vmem>>, vector<16x8xf32>
    tpu.vector_store %arg11[%c0_73, %c0_74], %104 {strides = array<i32>} : memref<96x8xf32, #tpu.memory_space<vmem>>, vector<16x8xf32>,
    %cst_75 = arith.constant 0.000000e+00 : f32
    %106 = vector.broadcast %cst_75 : f32 to vector<16x8xf32>
    %c80_76 = arith.constant 80 : index
    %c0_77 = arith.constant 0 : index
    %107 = vector.load %arg11[%c80_76, %c0_77] : memref<96x8xf32, #tpu.memory_space<vmem>>, vector<16x8xf32>
    tpu.vector_store %arg11[%c80_76, %c0_77], %106 {strides = array<i32>} : memref<96x8xf32, #tpu.memory_space<vmem>>, vector<16x8xf32>,
    %c16_78 = arith.constant 16 : index
    %c0_79 = arith.constant 0 : index
    %108 = vector.load %arg11[%c16_78, %c0_79] : memref<96x8xf32, #tpu.memory_space<vmem>>, vector<64x8xf32>
    tpu.vector_store %arg11[%c16_78, %c0_79], %103 {strides = array<i32>} : memref<96x8xf32, #tpu.memory_space<vmem>>, vector<64x8xf32>,
    %109 = vector.shape_cast %18 : vector<64x1xi1> to vector<64x1xi1>
    %110 = vector.broadcast %109 : vector<64x1xi1> to vector<64x8xi1>
    %111 = vector.shape_cast %20 : vector<64x1xi1> to vector<64x1xi1>
    %112 = vector.broadcast %111 : vector<64x1xi1> to vector<64x8xi1>
    %cst_80 = arith.constant 0.000000e+00 : f32
    %113 = vector.broadcast %cst_80 : f32 to vector<64x32xf32>
    %c8_81 = arith.constant 8 : index
    %c0_82 = arith.constant 0 : index
    %114 = vector.load %arg11[%c8_81, %c0_82] : memref<96x8xf32, #tpu.memory_space<vmem>>, vector<64x8xf32>
    %c1_i32_83 = arith.constant 1 : i32
    %115 = tpu.dynamic_rotate %114 by %c1_i32_83 dim 0 : vector<64x8xf32>, i32 -> vector<64x8xf32>
    %cst_84 = arith.constant 0.000000e+00 : f32
    %116 = vector.broadcast %cst_84 : f32 to vector<64x8xf32>
    %117 = arith.select %110, %115, %116 : vector<64x8xi1>, vector<64x8xf32>
    %c63_i32_85 = arith.constant 63 : i32
    %118 = tpu.dynamic_rotate %114 by %c63_i32_85 dim 0 : vector<64x8xf32>, i32 -> vector<64x8xf32>
    %cst_86 = arith.constant 0.000000e+00 : f32
    %119 = vector.broadcast %cst_86 : f32 to vector<64x8xf32>
    %120 = arith.select %112, %118, %119 : vector<64x8xi1>, vector<64x8xf32>
    %121 = arith.truncf %117 : vector<64x8xf32> to vector<64x8xbf16>
    %c0_87 = arith.constant 0 : index
    %c0_88 = arith.constant 0 : index
    %c0_89 = arith.constant 0 : index
    %c0_90 = arith.constant 0 : index
    %122 = vector.load %arg6[%c0_87, %c0_88, %c0_89, %c0_90] : memref<3x3x8x32xbf16, #tpu.memory_space<vmem>>, vector<1x1x8x32xbf16>
    %123 = vector.shape_cast %122 : vector<1x1x8x32xbf16> to vector<8x32xbf16>
    %cst_91 = arith.constant dense<0.000000e+00> : vector<64x32xf32>
    %124 = tpu.matmul %121, %123, %cst_91 {dimension_numbers = #tpu.dot_dimension_numbers<[1], [0], [0], [1], [0, 0, 1, 1], [], []>} : vector<64x8xbf16>, vector<8x32xbf16>, vector<64x32xf32> -> vector<64x32xf32>
    %125 = arith.addf %113, %124 : vector<64x32xf32>
    %126 = arith.truncf %114 : vector<64x8xf32> to vector<64x8xbf16>
    %c0_92 = arith.constant 0 : index
    %c1_93 = arith.constant 1 : index
    %c0_94 = arith.constant 0 : index
    %c0_95 = arith.constant 0 : index
    %127 = vector.load %arg6[%c0_92, %c1_93, %c0_94, %c0_95] : memref<3x3x8x32xbf16, #tpu.memory_space<vmem>>, vector<1x1x8x32xbf16>
    %128 = vector.shape_cast %127 : vector<1x1x8x32xbf16> to vector<8x32xbf16>
    %cst_96 = arith.constant dense<0.000000e+00> : vector<64x32xf32>
    %129 = tpu.matmul %126, %128, %cst_96 {dimension_numbers = #tpu.dot_dimension_numbers<[1], [0], [0], [1], [0, 0, 1, 1], [], []>} : vector<64x8xbf16>, vector<8x32xbf16>, vector<64x32xf32> -> vector<64x32xf32>
    %130 = arith.addf %125, %129 : vector<64x32xf32>
    %131 = arith.truncf %120 : vector<64x8xf32> to vector<64x8xbf16>
    %c0_97 = arith.constant 0 : index
    %c2_98 = arith.constant 2 : index
    %c0_99 = arith.constant 0 : index
    %c0_100 = arith.constant 0 : index
    %132 = vector.load %arg6[%c0_97, %c2_98, %c0_99, %c0_100] : memref<3x3x8x32xbf16, #tpu.memory_space<vmem>>, vector<1x1x8x32xbf16>
    %133 = vector.shape_cast %132 : vector<1x1x8x32xbf16> to vector<8x32xbf16>
    %cst_101 = arith.constant dense<0.000000e+00> : vector<64x32xf32>
    %134 = tpu.matmul %131, %133, %cst_101 {dimension_numbers = #tpu.dot_dimension_numbers<[1], [0], [0], [1], [0, 0, 1, 1], [], []>} : vector<64x8xbf16>, vector<8x32xbf16>, vector<64x32xf32> -> vector<64x32xf32>
    %135 = arith.addf %130, %134 : vector<64x32xf32>
    %c16_102 = arith.constant 16 : index
    %c0_103 = arith.constant 0 : index
    %136 = vector.load %arg11[%c16_102, %c0_103] : memref<96x8xf32, #tpu.memory_space<vmem>>, vector<64x8xf32>
    %c1_i32_104 = arith.constant 1 : i32
    %137 = tpu.dynamic_rotate %136 by %c1_i32_104 dim 0 : vector<64x8xf32>, i32 -> vector<64x8xf32>
    %cst_105 = arith.constant 0.000000e+00 : f32
    %138 = vector.broadcast %cst_105 : f32 to vector<64x8xf32>
    %139 = arith.select %110, %137, %138 : vector<64x8xi1>, vector<64x8xf32>
    %c63_i32_106 = arith.constant 63 : i32
    %140 = tpu.dynamic_rotate %136 by %c63_i32_106 dim 0 : vector<64x8xf32>, i32 -> vector<64x8xf32>
    %cst_107 = arith.constant 0.000000e+00 : f32
    %141 = vector.broadcast %cst_107 : f32 to vector<64x8xf32>
    %142 = arith.select %112, %140, %141 : vector<64x8xi1>, vector<64x8xf32>
    %143 = arith.truncf %139 : vector<64x8xf32> to vector<64x8xbf16>
    %c1_108 = arith.constant 1 : index
    %c0_109 = arith.constant 0 : index
    %c0_110 = arith.constant 0 : index
    %c0_111 = arith.constant 0 : index
    %144 = vector.load %arg6[%c1_108, %c0_109, %c0_110, %c0_111] : memref<3x3x8x32xbf16, #tpu.memory_space<vmem>>, vector<1x1x8x32xbf16>
    %145 = vector.shape_cast %144 : vector<1x1x8x32xbf16> to vector<8x32xbf16>
    %cst_112 = arith.constant dense<0.000000e+00> : vector<64x32xf32>
    %146 = tpu.matmul %143, %145, %cst_112 {dimension_numbers = #tpu.dot_dimension_numbers<[1], [0], [0], [1], [0, 0, 1, 1], [], []>} : vector<64x8xbf16>, vector<8x32xbf16>, vector<64x32xf32> -> vector<64x32xf32>
    %147 = arith.addf %135, %146 : vector<64x32xf32>
    %148 = arith.truncf %136 : vector<64x8xf32> to vector<64x8xbf16>
    %c1_113 = arith.constant 1 : index
    %c1_114 = arith.constant 1 : index
    %c0_115 = arith.constant 0 : index
    %c0_116 = arith.constant 0 : index
    %149 = vector.load %arg6[%c1_113, %c1_114, %c0_115, %c0_116] : memref<3x3x8x32xbf16, #tpu.memory_space<vmem>>, vector<1x1x8x32xbf16>
    %150 = vector.shape_cast %149 : vector<1x1x8x32xbf16> to vector<8x32xbf16>
    %cst_117 = arith.constant dense<0.000000e+00> : vector<64x32xf32>
    %151 = tpu.matmul %148, %150, %cst_117 {dimension_numbers = #tpu.dot_dimension_numbers<[1], [0], [0], [1], [0, 0, 1, 1], [], []>} : vector<64x8xbf16>, vector<8x32xbf16>, vector<64x32xf32> -> vector<64x32xf32>
    %152 = arith.addf %147, %151 : vector<64x32xf32>
    %153 = arith.truncf %142 : vector<64x8xf32> to vector<64x8xbf16>
    %c1_118 = arith.constant 1 : index
    %c2_119 = arith.constant 2 : index
    %c0_120 = arith.constant 0 : index
    %c0_121 = arith.constant 0 : index
    %154 = vector.load %arg6[%c1_118, %c2_119, %c0_120, %c0_121] : memref<3x3x8x32xbf16, #tpu.memory_space<vmem>>, vector<1x1x8x32xbf16>
    %155 = vector.shape_cast %154 : vector<1x1x8x32xbf16> to vector<8x32xbf16>
    %cst_122 = arith.constant dense<0.000000e+00> : vector<64x32xf32>
    %156 = tpu.matmul %153, %155, %cst_122 {dimension_numbers = #tpu.dot_dimension_numbers<[1], [0], [0], [1], [0, 0, 1, 1], [], []>} : vector<64x8xbf16>, vector<8x32xbf16>, vector<64x32xf32> -> vector<64x32xf32>
    %157 = arith.addf %152, %156 : vector<64x32xf32>
    %c24_123 = arith.constant 24 : index
    %c0_124 = arith.constant 0 : index
    %158 = vector.load %arg11[%c24_123, %c0_124] : memref<96x8xf32, #tpu.memory_space<vmem>>, vector<64x8xf32>
    %c1_i32_125 = arith.constant 1 : i32
    %159 = tpu.dynamic_rotate %158 by %c1_i32_125 dim 0 : vector<64x8xf32>, i32 -> vector<64x8xf32>
    %cst_126 = arith.constant 0.000000e+00 : f32
    %160 = vector.broadcast %cst_126 : f32 to vector<64x8xf32>
    %161 = arith.select %110, %159, %160 : vector<64x8xi1>, vector<64x8xf32>
    %c63_i32_127 = arith.constant 63 : i32
    %162 = tpu.dynamic_rotate %158 by %c63_i32_127 dim 0 : vector<64x8xf32>, i32 -> vector<64x8xf32>
    %cst_128 = arith.constant 0.000000e+00 : f32
    %163 = vector.broadcast %cst_128 : f32 to vector<64x8xf32>
    %164 = arith.select %112, %162, %163 : vector<64x8xi1>, vector<64x8xf32>
    %165 = arith.truncf %161 : vector<64x8xf32> to vector<64x8xbf16>
    %c2_129 = arith.constant 2 : index
    %c0_130 = arith.constant 0 : index
    %c0_131 = arith.constant 0 : index
    %c0_132 = arith.constant 0 : index
    %166 = vector.load %arg6[%c2_129, %c0_130, %c0_131, %c0_132] : memref<3x3x8x32xbf16, #tpu.memory_space<vmem>>, vector<1x1x8x32xbf16>
    %167 = vector.shape_cast %166 : vector<1x1x8x32xbf16> to vector<8x32xbf16>
    %cst_133 = arith.constant dense<0.000000e+00> : vector<64x32xf32>
    %168 = tpu.matmul %165, %167, %cst_133 {dimension_numbers = #tpu.dot_dimension_numbers<[1], [0], [0], [1], [0, 0, 1, 1], [], []>} : vector<64x8xbf16>, vector<8x32xbf16>, vector<64x32xf32> -> vector<64x32xf32>
    %169 = arith.addf %157, %168 : vector<64x32xf32>
    %170 = arith.truncf %158 : vector<64x8xf32> to vector<64x8xbf16>
    %c2_134 = arith.constant 2 : index
    %c1_135 = arith.constant 1 : index
    %c0_136 = arith.constant 0 : index
    %c0_137 = arith.constant 0 : index
    %171 = vector.load %arg6[%c2_134, %c1_135, %c0_136, %c0_137] : memref<3x3x8x32xbf16, #tpu.memory_space<vmem>>, vector<1x1x8x32xbf16>
    %172 = vector.shape_cast %171 : vector<1x1x8x32xbf16> to vector<8x32xbf16>
    %cst_138 = arith.constant dense<0.000000e+00> : vector<64x32xf32>
    %173 = tpu.matmul %170, %172, %cst_138 {dimension_numbers = #tpu.dot_dimension_numbers<[1], [0], [0], [1], [0, 0, 1, 1], [], []>} : vector<64x8xbf16>, vector<8x32xbf16>, vector<64x32xf32> -> vector<64x32xf32>
    %174 = arith.addf %169, %173 : vector<64x32xf32>
    %175 = arith.truncf %164 : vector<64x8xf32> to vector<64x8xbf16>
    %c2_139 = arith.constant 2 : index
    %c2_140 = arith.constant 2 : index
    %c0_141 = arith.constant 0 : index
    %c0_142 = arith.constant 0 : index
    %176 = vector.load %arg6[%c2_139, %c2_140, %c0_141, %c0_142] : memref<3x3x8x32xbf16, #tpu.memory_space<vmem>>, vector<1x1x8x32xbf16>
    %177 = vector.shape_cast %176 : vector<1x1x8x32xbf16> to vector<8x32xbf16>
    %cst_143 = arith.constant dense<0.000000e+00> : vector<64x32xf32>
    %178 = tpu.matmul %175, %177, %cst_143 {dimension_numbers = #tpu.dot_dimension_numbers<[1], [0], [0], [1], [0, 0, 1, 1], [], []>} : vector<64x8xbf16>, vector<8x32xbf16>, vector<64x32xf32> -> vector<64x32xf32>
    %179 = arith.addf %174, %178 : vector<64x32xf32>
    %180 = arith.mulf %22, %179 : vector<64x32xf32>
    %c0_144 = arith.constant 0 : index
    %c0_145 = arith.constant 0 : index
    %181 = vector.load %arg1[%c0_144, %c0_145] : memref<64x16xbf16, #tpu.memory_space<vmem>>, vector<64x16xbf16>
    %c0_146 = arith.constant 0 : index
    %c0_147 = arith.constant 0 : index
    %182 = vector.load %arg7[%c0_146, %c0_147] : memref<16x32xbf16, #tpu.memory_space<vmem>>, vector<16x32xbf16>
    %cst_148 = arith.constant dense<0.000000e+00> : vector<64x32xf32>
    %183 = tpu.matmul %181, %182, %cst_148 {dimension_numbers = #tpu.dot_dimension_numbers<[1], [0], [0], [1], [0, 0, 1, 1], [], []>} : vector<64x16xbf16>, vector<16x32xbf16>, vector<64x32xf32> -> vector<64x32xf32>
    %cst_149 = arith.constant 9.99999974E-6 : f32
    %184 = vector.broadcast %cst_149 : f32 to vector<64x32xf32>
    %185 = arith.addf %183, %184 : vector<64x32xf32>
    %186 = tpu.reciprocal %185 {approx = true} : vector<64x32xf32> -> vector<64x32xf32>
    %187 = arith.mulf %180, %186 : vector<64x32xf32>
    %188 = arith.truncf %187 : vector<64x32xf32> to vector<64x32xbf16>
    %c0_150 = arith.constant 0 : index
    %c0_151 = arith.constant 0 : index
    %189 = vector.load %arg8[%c0_150, %c0_151] : memref<32x16xbf16, #tpu.memory_space<vmem>>, vector<32x16xbf16>
    %cst_152 = arith.constant dense<0.000000e+00> : vector<64x16xf32>
    %190 = tpu.matmul %188, %189, %cst_152 {dimension_numbers = #tpu.dot_dimension_numbers<[1], [0], [0], [1], [0, 0, 1, 1], [], []>} : vector<64x32xbf16>, vector<32x16xbf16>, vector<64x16xf32> -> vector<64x16xf32>
    %c0_153 = arith.constant 0 : index
    %c0_154 = arith.constant 0 : index
    %191 = vector.load %arg4[%c0_153, %c0_154] : memref<64x16xf32, #tpu.memory_space<vmem>>, vector<64x16xf32>
    %192 = arith.extf %181 : vector<64x16xbf16> to vector<64x16xf32>
    %193 = arith.mulf %192, %190 : vector<64x16xf32>
    %194 = arith.addf %191, %193 : vector<64x16xf32>
    %c0_155 = arith.constant 0 : index
    %c0_156 = arith.constant 0 : index
    %195 = vector.load %arg9[%c0_155, %c0_156] : memref<64x16xf32, #tpu.memory_space<vmem>>, vector<64x16xf32>
    tpu.vector_store %arg9[%c0_155, %c0_156], %194 {strides = array<i32>} : memref<64x16xf32, #tpu.memory_space<vmem>>, vector<64x16xf32>,
    return
  }
  func.func @transform_0(%arg0: i32) -> (i32, i32) {
    %c0_i32 = arith.constant 0 : i32
    %c0_i32_0 = arith.constant 0 : i32
    return %arg0, %c0_i32 : i32, i32
  }
  func.func @transform_1(%arg0: i32) -> (i32, i32) {
    %c0_i32 = arith.constant 0 : i32
    %c0_i32_0 = arith.constant 0 : i32
    return %arg0, %c0_i32 : i32, i32
  }
  func.func @transform_2(%arg0: i32) -> (i32, i32) {
    %c0_i32 = arith.constant 0 : i32
    %c0_i32_0 = arith.constant 0 : i32
    return %arg0, %c0_i32 : i32, i32
  }
  func.func @transform_3(%arg0: i32) -> (i32, i32) {
    %c0_i32 = arith.constant 0 : i32
    %c0_i32_0 = arith.constant 0 : i32
    return %arg0, %c0_i32 : i32, i32
  }
  func.func @transform_4(%arg0: i32) -> (i32, i32, i32, i32) {
    %c0_i32 = arith.constant 0 : i32
    %c0_i32_0 = arith.constant 0 : i32
    %c0_i32_1 = arith.constant 0 : i32
    %c0_i32_2 = arith.constant 0 : i32
    %c0_i32_3 = arith.constant 0 : i32
    return %c0_i32, %c0_i32_0, %c0_i32_1, %c0_i32_2 : i32, i32, i32, i32
  }
  func.func @transform_5(%arg0: i32) -> (i32, i32, i32, i32) {
    %c0_i32 = arith.constant 0 : i32
    %c0_i32_0 = arith.constant 0 : i32
    %c0_i32_1 = arith.constant 0 : i32
    %c0_i32_2 = arith.constant 0 : i32
    %c0_i32_3 = arith.constant 0 : i32
    return %c0_i32, %c0_i32_0, %c0_i32_1, %c0_i32_2 : i32, i32, i32, i32
  }
  func.func @transform_6(%arg0: i32) -> (i32, i32) {
    %c0_i32 = arith.constant 0 : i32
    %c0_i32_0 = arith.constant 0 : i32
    %c0_i32_1 = arith.constant 0 : i32
    return %c0_i32, %c0_i32_0 : i32, i32
  }
  func.func @transform_7(%arg0: i32) -> (i32, i32) {
    %c0_i32 = arith.constant 0 : i32
    %c0_i32_0 = arith.constant 0 : i32
    %c0_i32_1 = arith.constant 0 : i32
    return %c0_i32, %c0_i32_0 : i32, i32
  }
  func.func @transform_8(%arg0: i32) -> (i32, i32) {
    %c0_i32 = arith.constant 0 : i32
    %c0_i32_0 = arith.constant 0 : i32
    return %arg0, %c0_i32 : i32, i32
  }
}

</mosaic_0001>

<bundles_post_ra>
// kernel: lrp_dense_layer.2
= control target key start
LH: loop header
LB: loop body
LE: loop exit
PB: predicated region body
PF: predicated region fallthrough
CT: control target
= control target key end

     0   :  { %vm168_vm0 = vcmask 125952   ;;  %vm193_vm1 = vcmask 130048   ;;  %vm441_vm2 = vcmask 257024   ;;  %s884_s3 = inlined_call_operand.vmem [shape: bf16[16,32], index: 3, kind: input, shape index: {}]   ;;  %s885_s0 = inlined_call_operand.vmem [shape: f32[128,16], index: 0, kind: input, shape index: {}]   ;;  %s886_s1 = inlined_call_operand.vmem [shape: f32[1,16], index: 1, kind: input, shape index: {}]   ;;  %s887_s2 = inlined_call_operand.vmem [shape: f32[1,16], index: 2, kind: input, shape index: {}]   ;;  %s888_s6 = inlined_call_operand.vmem [shape: bf16[128,16], index: 6, kind: output, shape index: {0}]   ;;  %s889_s4 = inlined_call_operand.vmem [shape: f32[1,32], index: 4, kind: input, shape index: {}]   ;;  %s890_s5 = inlined_call_operand.vmem [shape: f32[1,32], index: 5, kind: input, shape index: {}]   ;;  %s891_s7 = inlined_call_operand.vmem [shape: bf16[128,32], index: 7, kind: output, shape index: {1}]  }
   0x1   :  { %v572_v0 = vld [vmem:[%s884_s3] sm:$0xff]   ;;  %v27_v2 = vld [vmem:[%s885_s0 + $0x8] sm:$0xff]  ;;  %v28_v11 = vld [vmem:[%s885_s0 + $0x10] sm:$0xff] }
   0x2   :  { %v26_v1 = vld [vmem:[%s885_s0] sm:$0xff]  ;;  %552 = vmatprep.subr.bf16.mxu0 %v572_v0  ;;  %570 = vmatprep.subr.bf16.mxu1 %v572_v0  ;;  %v35_v8 = vld [vmem:[%s885_s0 + $0x48] sm:$0xff]  ;;  %v29_v12 = vld [vmem:[%s885_s0 + $0x18] sm:$0xff] }
   0x3   :  { %v625_v3 = vld [vmem:[%s886_s1] ss:$0 sm:$0xff]  ;;  %553 = vmatpush3.bf16.msra.mxu0 %v572_v0  ;;  %571 = vmatpush3.bf16.msra.mxu1 %v572_v0  ;;  %v36_v13 = vld [vmem:[%s885_s0 + $0x50] sm:$0xff]  ;;  %v37_v18 = vld [vmem:[%s885_s0 + $0x58] sm:$0xff] }
   0x4   :  { %v49_v4 = vmul.f32 %v625_v3, %v26_v1  ;;  %v50_v5 = vmul.f32 %v625_v3, %v27_v2  ;;  %v632_v6 = vld [vmem:[%s887_s2] ss:$0 sm:$0xff]  ;;  %v58_v10 = vmul.f32 %v625_v3, %v35_v8  ;;  %v51_v16 = vmul.f32 %v625_v3, %v28_v11  ;;  %v31_v36 = vld [vmem:[%s885_s0 + $0x28] sm:$0xff]  ;;  %v32_v47 = vld [vmem:[%s885_s0 + $0x30] sm:$0xff] }
   0x5   :  { %v34_v7 = vld [vmem:[%s885_s0 + $0x40] sm:$0xff]  ;;  %v52_v17 = vmul.f32 %v625_v3, %v29_v12  ;;  %v59_v21 = vmul.f32 %v625_v3, %v36_v13  ;;  %v60_v22 = vmul.f32 %v625_v3, %v37_v18  ;;  %v39_v46 = vld [vmem:[%s885_s0 + $0x68] sm:$0xff]  ;;  %v54_v50 = vmul.f32 %v625_v3, %v31_v36  ;;  %v33_v52 = vld [vmem:[%s885_s0 + $0x38] sm:$0xff] }
   0x6   :  { %v57_v9 = vmul.f32 %v625_v3, %v34_v7  ;;  %v72_v14 = vadd.f32 %v632_v6, %v49_v4  ;;  %v73_v15 = vadd.f32 %v632_v6, %v50_v5  ;;  %v81_v20 = vadd.f32 %v632_v6, %v58_v10  ;;  %v30_v31 = vld [vmem:[%s885_s0 + $0x20] sm:$0xff]  ;;  %v40_v53 = vld [vmem:[%s885_s0 + $0x70] sm:$0xff]  ;;  %v41_v54 = vld [vmem:[%s885_s0 + $0x78] sm:$0xff] }
   0x7   :  { %v74_v25 = vadd.f32 %v632_v6, %v51_v16  ;;  %v75_v26 = vadd.f32 %v632_v6, %v52_v17  ;;  %v82_v29 = vadd.f32 %v632_v6, %v59_v21  ;;  %v83_v30 = vadd.f32 %v632_v6, %v60_v22  ;;  %v38_v37 = vld [vmem:[%s885_s0 + $0x60] sm:$0xff] }
   0x8   :  { %v80_v19 = vadd.f32 %v632_v6, %v57_v9  ;;  %v88_v23 = vmax.f32 %v72_v14, 0.0  ;;  %v89_v24 = vmax.f32 %v73_v15, 0.0  ;;  %v97_v28 = vmax.f32 %v81_v20, 0.0 }
   0x9   :  { %v90_v35 = vmax.f32 %v74_v25, 0.0  ;;  %v91_v41 = vmax.f32 %v75_v26, 0.0  ;;  %v98_v43 = vmax.f32 %v82_v29, 0.0  ;;  %v99_v44 = vmax.f32 %v83_v30, 0.0  ;;  %v786_v29 = vld [vmem:[%s890_s5] ss:$0 sm:$0xff] }
   0xa   :  { %v96_v27 = vmax.f32 %v80_v19, 0.0  ;;  %v104_v32 = vpack.c.bf16 %v89_v24, %v88_v23  ;;  %v511_v33 = vpack.c.bf16 %v88_v23, %v88_v23  ;;  %v512_v34 = vpack.c.bf16 %v89_v24, %v89_v24 }
   0xb   :  { %v520_v40 = vpack.c.bf16 %v97_v28, %v97_v28  ;;  %v513_v42 = vpack.c.bf16 %v90_v35, %v90_v35  ;;  %v53_v45 = vmul.f32 %v625_v3, %v30_v31  ;;  %v105_v48 = vpack.c.bf16 %v91_v41, %v90_v35 }
   0xc   :  { %v108_v38 = vpack.c.bf16 %v97_v28, %v96_v27  ;;  %v519_v39 = vpack.c.bf16 %v96_v27, %v96_v27  ;;  %169 = vst.msk [vmem:[%s888_s6] sm:$0xf] %vm168_vm0, %v511_v33  ;;  %170 = vst.msk [vmem:[%s888_s6 + $0x4] sm:$0xf] %vm168_vm0, %v512_v34  ;;  %554 = vmatprep.mubr.msk.bf16.mxu0 %vm193_vm1, %v104_v32  ;;  %v514_v49 = vpack.c.bf16 %v91_v41, %v91_v41  ;;  %v781_v27 = vld [vmem:[%s889_s4] ss:$0 sm:$0xff] }
   0xd   :  { %178 = vst.msk [vmem:[%s888_s6 + $0x24] sm:$0xf] %vm168_vm0, %v520_v40  ;;  %v61_v51 = vmul.f32 %v625_v3, %v38_v37  ;;  %171 = vst.msk [vmem:[%s888_s6 + $0x8] sm:$0xf] %vm168_vm0, %v513_v42  ;;  %v109_v55 = vpack.c.bf16 %v99_v44, %v98_v43  ;;  %v521_v56 = vpack.c.bf16 %v98_v43, %v98_v43  ;;  %555 = vmatmul.mubr.msk.bf16.vlgmr.msra.gmra.mrb[0].mxu0 %vm193_vm1, %v105_v48 }
   0xe   :  { %177 = vst.msk [vmem:[%s888_s6 + $0x20] sm:$0xf] %vm168_vm0, %v519_v39  ;;  %562 = vmatprep.mubr.msk.bf16.mxu1 %vm193_vm1, %v108_v38  ;;  %v522_v57 = vpack.c.bf16 %v99_v44, %v99_v44  ;;  %v76_v58 = vadd.f32 %v632_v6, %v53_v45  ;;  %172 = vst.msk [vmem:[%s888_s6 + $0xc] sm:$0xf] %vm168_vm0, %v514_v49  ;;  %v77_v59 = vadd.f32 %v632_v6, %v54_v50 }
   0xf   :  { %v62_v60 = vmul.f32 %v625_v3, %v39_v46  ;;  %v84_v61 = vadd.f32 %v632_v6, %v61_v51  ;;  %v55_v62 = vmul.f32 %v625_v3, %v32_v47  ;;  %179 = vst.msk [vmem:[%s888_s6 + $0x28] sm:$0xf] %vm168_vm0, %v521_v56  ;;  %563 = vmatmul.mubr.msk.bf16.vlgmr.msra.gmra.mrb[0].mxu1 %vm193_vm1, %v109_v55 }
  0x10   :  { %180 = vst.msk [vmem:[%s888_s6 + $0x2c] sm:$0xf] %vm168_vm0, %v522_v57  ;;  %v92_v63 = vmax.f32 %v76_v58, 0.0  ;;  %v56_v0 = vmul.f32 %v625_v3, %v33_v52  ;;  %v63_v1 = vmul.f32 %v625_v3, %v40_v53  ;;  %v64_v2 = vmul.f32 %v625_v3, %v41_v54 }
  0x11   :  { %v93_v4 = vmax.f32 %v77_v59, 0.0  ;;  %v85_v5 = vadd.f32 %v632_v6, %v62_v60  ;;  %v100_v7 = vmax.f32 %v84_v61, 0.0  ;;  %v78_v8 = vadd.f32 %v632_v6, %v55_v62 }
  0x12   :  { %v515_v9 = vpack.c.bf16 %v92_v63, %v92_v63  ;;  %v79_v10 = vadd.f32 %v632_v6, %v56_v0  ;;  %v86_v11 = vadd.f32 %v632_v6, %v63_v1  ;;  %v87_v12 = vadd.f32 %v632_v6, %v64_v2 }
  0x13   :  { %v106_v13 = vpack.c.bf16 %v93_v4, %v92_v63  ;;  %v516_v14 = vpack.c.bf16 %v93_v4, %v93_v4  ;;  %v101_v15 = vmax.f32 %v85_v5, 0.0  ;;  %v523_v16 = vpack.c.bf16 %v100_v7, %v100_v7 }
  0x14   :  { %173 = vst.msk [vmem:[%s888_s6 + $0x10] sm:$0xf] %vm168_vm0, %v515_v9  ;;  %v94_v3 = vmax.f32 %v78_v8, 0.0  ;;  %v95_v17 = vmax.f32 %v79_v10, 0.0  ;;  %v102_v18 = vmax.f32 %v86_v11, 0.0  ;;  %v103_v19 = vmax.f32 %v87_v12, 0.0 }
  0x15   :  { %174 = vst.msk [vmem:[%s888_s6 + $0x14] sm:$0xf] %vm168_vm0, %v516_v14  ;;  %558 = vmatprep.mubr.msk.bf16.mxu0 %vm193_vm1, %v106_v13  ;;  %v110_v6 = vpack.c.bf16 %v101_v15, %v100_v7  ;;  %v524_v20 = vpack.c.bf16 %v101_v15, %v101_v15  ;;  %181 = vst.msk [vmem:[%s888_s6 + $0x30] sm:$0xf] %vm168_vm0, %v523_v16 }
  0x16   :  { %v107_v21 = vpack.c.bf16 %v95_v17, %v94_v3  ;;  %v517_v22 = vpack.c.bf16 %v94_v3, %v94_v3  ;;  %v518_v23 = vpack.c.bf16 %v95_v17, %v95_v17  ;;  %v111_v24 = vpack.c.bf16 %v103_v19, %v102_v18 }
  0x17   :  { %182 = vst.msk [vmem:[%s888_s6 + $0x34] sm:$0xf] %vm168_vm0, %v524_v20  ;;  %566 = vmatprep.mubr.msk.bf16.mxu1 %vm193_vm1, %v110_v6  ;;  %v525_v25 = vpack.c.bf16 %v102_v18, %v102_v18  ;;  %v526_v26 = vpack.c.bf16 %v103_v19, %v103_v19 }
  0x18   :  { %175 = vst.msk [vmem:[%s888_s6 + $0x18] sm:$0xf] %vm168_vm0, %v517_v22  ;;  %176 = vst.msk [vmem:[%s888_s6 + $0x1c] sm:$0xf] %vm168_vm0, %v518_v23  ;;  %559 = vmatmul.mubr.msk.bf16.gmra.mrb[4].mxu0 %vm193_vm1, %v107_v21  ;;  %567 = vmatmul.mubr.msk.bf16.gmra.mrb[4].mxu1 %vm193_vm1, %v111_v24 }
  0x19   :  { %183 = vst.msk [vmem:[%s888_s6 + $0x38] sm:$0xf] %vm168_vm0, %v525_v25  ;;  %184 = vst.msk [vmem:[%s888_s6 + $0x3c] sm:$0xf] %vm168_vm0, %v526_v26 }
  0xe0   :  { %v556_v28 = vpop.f32.mrb[0].mxu0 }
  0xe1   :  { %v324_v30 = vmul.f32 %v556_v28, %v781_v27  ;;  %v252_v32 = vpop.f32.mrb[1].mxu0 }
  0xe2   :  { %v564_v31 = vpop.f32.mrb[0].mxu1  ;;  %v322_v34 = vmul.f32 %v781_v27, %v252_v32  ;;  %v557_v36 = vpop.f32.mrb[2].mxu0 }
  0xe3   :  { %v332_v33 = vmul.f32 %v564_v31, %v781_v27  ;;  %v284_v35 = vpop.f32.mrb[1].mxu1  ;;  %v347_v37 = vadd.f32 %v786_v29, %v324_v30  ;;  %v325_v39 = vmul.f32 %v557_v36, %v781_v27  ;;  %v255_v41 = vpop.f32.mrb[3].mxu0 }
  0xe4   :  { %v330_v38 = vmul.f32 %v781_v27, %v284_v35  ;;  %v565_v40 = vpop.f32.mrb[2].mxu1  ;;  %v345_v43 = vadd.f32 %v786_v29, %v322_v34  ;;  %v323_v45 = vmul.f32 %v781_v27, %v255_v41 }
  0xe5   :  { %v355_v42 = vadd.f32 %v786_v29, %v332_v33  ;;  %v333_v44 = vmul.f32 %v565_v40, %v781_v27  ;;  %v287_v46 = vpop.f32.mrb[3].mxu1  ;;  %v363_v47 = vmax.f32 %v347_v37, 0.0  ;;  %v348_v49 = vadd.f32 %v786_v29, %v325_v39 }
  0xe6   :  { %v353_v48 = vadd.f32 %v786_v29, %v330_v38  ;;  %v331_v50 = vmul.f32 %v781_v27, %v287_v46  ;;  %v361_v52 = vmax.f32 %v345_v43, 0.0  ;;  %v346_v54 = vadd.f32 %v786_v29, %v323_v45 }
  0xe7   :  { %v371_v51 = vmax.f32 %v355_v42, 0.0  ;;  %v356_v53 = vadd.f32 %v786_v29, %v333_v44  ;;  %v529_v55 = vpack.c.bf16 %v363_v47, %v363_v47  ;;  %v364_v57 = vmax.f32 %v348_v49, 0.0 }
  0xe8   :  { %v369_v56 = vmax.f32 %v353_v48, 0.0  ;;  %v354_v58 = vadd.f32 %v786_v29, %v331_v50  ;;  %v527_v60 = vpack.c.bf16 %v361_v52, %v361_v52  ;;  %v362_v62 = vmax.f32 %v346_v54, 0.0 }
  0xe9   :  { %v537_v59 = vpack.c.bf16 %v371_v51, %v371_v51  ;;  %v372_v61 = vmax.f32 %v356_v53, 0.0  ;;  %444 = vst.msk [vmem:[%s891_s7 + $0x8] sm:$0xf] %vm441_vm2, %v529_v55  ;;  %v530_v0 = vpack.c.bf16 %v364_v57, %v364_v57 }
  0xea   :  { %v535_v63 = vpack.c.bf16 %v369_v56, %v369_v56  ;;  %v370_v1 = vmax.f32 %v354_v58, 0.0  ;;  %442 = vst.msk [vmem:[%s891_s7] sm:$0xf] %vm441_vm2, %v527_v60  ;;  %v528_v7 = vpack.c.bf16 %v362_v62, %v362_v62 }
  0xeb   :  { %v560_v2 = vpop.f32.mrb[4].mxu0  ;;  %v568_v4 = vpop.f32.mrb[4].mxu1  ;;  %452 = vst.msk [vmem:[%s891_s7 + $0x28] sm:$0xf] %vm441_vm2, %v537_v59  ;;  %v538_v5 = vpack.c.bf16 %v372_v61, %v372_v61  ;;  %445 = vst.msk [vmem:[%s891_s7 + $0xc] sm:$0xf] %vm441_vm2, %v530_v0 }
  0xec   :  { %v328_v8 = vmul.f32 %v560_v2, %v781_v27  ;;  %v336_v9 = vmul.f32 %v568_v4, %v781_v27  ;;  %v268_v10 = vpop.f32.mrb[5].mxu0  ;;  %v300_v11 = vpop.f32.mrb[5].mxu1  ;;  %450 = vst.msk [vmem:[%s891_s7 + $0x20] sm:$0xf] %vm441_vm2, %v535_v63  ;;  %v536_v12 = vpack.c.bf16 %v370_v1, %v370_v1  ;;  %443 = vst.msk [vmem:[%s891_s7 + $0x4] sm:$0xf] %vm441_vm2, %v528_v7 }
  0xed   :  { %v326_v13 = vmul.f32 %v781_v27, %v268_v10  ;;  %v334_v14 = vmul.f32 %v781_v27, %v300_v11  ;;  %v561_v15 = vpop.f32.mrb[6].mxu0  ;;  %v569_v16 = vpop.f32.mrb[6].mxu1  ;;  %453 = vst.msk [vmem:[%s891_s7 + $0x2c] sm:$0xf] %vm441_vm2, %v538_v5 }
  0xee   :  { %v351_v3 = vadd.f32 %v786_v29, %v328_v8  ;;  %v359_v17 = vadd.f32 %v786_v29, %v336_v9  ;;  %v329_v18 = vmul.f32 %v561_v15, %v781_v27  ;;  %v337_v19 = vmul.f32 %v569_v16, %v781_v27  ;;  %v271_v6 = vpop.f32.mrb[7].mxu0  ;;  %v303_v20 = vpop.f32.mrb[7].mxu1  ;;  %451 = vst.msk [vmem:[%s891_s7 + $0x24] sm:$0xf] %vm441_vm2, %v536_v12 }
  0xef   :  { %v349_v21 = vadd.f32 %v786_v29, %v326_v13  ;;  %v357_v22 = vadd.f32 %v786_v29, %v334_v14  ;;  %v327_v23 = vmul.f32 %v781_v27, %v271_v6  ;;  %v335_v24 = vmul.f32 %v781_v27, %v303_v20 }
  0xf0   :  { %v367_v25 = vmax.f32 %v351_v3, 0.0  ;;  %v375_v26 = vmax.f32 %v359_v17, 0.0  ;;  %v352_v28 = vadd.f32 %v786_v29, %v329_v18  ;;  %v360_v30 = vadd.f32 %v786_v29, %v337_v19 }
  0xf1   :  { %v365_v31 = vmax.f32 %v349_v21, 0.0  ;;  %v373_v32 = vmax.f32 %v357_v22, 0.0  ;;  %v350_v33 = vadd.f32 %v786_v29, %v327_v23  ;;  %v358_v34 = vadd.f32 %v786_v29, %v335_v24 }
  0xf2   :  { %v533_v35 = vpack.c.bf16 %v367_v25, %v367_v25  ;;  %v541_v36 = vpack.c.bf16 %v375_v26, %v375_v26  ;;  %v368_v37 = vmax.f32 %v352_v28, 0.0  ;;  %v376_v38 = vmax.f32 %v360_v30, 0.0 }
  0xf3   :  { %v531_v39 = vpack.c.bf16 %v365_v31, %v365_v31  ;;  %v539_v40 = vpack.c.bf16 %v373_v32, %v373_v32  ;;  %v366_v41 = vmax.f32 %v350_v33, 0.0  ;;  %v374_v27 = vmax.f32 %v358_v34, 0.0 }
  0xf4   :  { %448 = vst.msk [vmem:[%s891_s7 + $0x18] sm:$0xf] %vm441_vm2, %v533_v35  ;;  %456 = vst.msk [vmem:[%s891_s7 + $0x38] sm:$0xf] %vm441_vm2, %v541_v36  ;;  %v534_v42 = vpack.c.bf16 %v368_v37, %v368_v37  ;;  %v542_v29 = vpack.c.bf16 %v376_v38, %v376_v38 }
  0xf5   :  { %446 = vst.msk [vmem:[%s891_s7 + $0x10] sm:$0xf] %vm441_vm2, %v531_v39  ;;  %454 = vst.msk [vmem:[%s891_s7 + $0x30] sm:$0xf] %vm441_vm2, %v539_v40  ;;  %v532_v43 = vpack.c.bf16 %v366_v41, %v366_v41  ;;  %v540_v44 = vpack.c.bf16 %v374_v27, %v374_v27 }
  0xf6   :  { %449 = vst.msk [vmem:[%s891_s7 + $0x1c] sm:$0xf] %vm441_vm2, %v534_v42  ;;  %457 = vst.msk [vmem:[%s891_s7 + $0x3c] sm:$0xf] %vm441_vm2, %v542_v29 }
  0xf7   :  { %447 = vst.msk [vmem:[%s891_s7 + $0x14] sm:$0xf] %vm441_vm2, %v532_v43  ;;  %455 = vst.msk [vmem:[%s891_s7 + $0x34] sm:$0xf] %vm441_vm2, %v540_v44 }

// kernel: lrp_dense_layer.3
= control target key start
LH: loop header
LB: loop body
LE: loop exit
PB: predicated region body
PF: predicated region fallthrough
CT: control target
= control target key end

     0   :  { %13 = vsyncpa [#allocation5], 0  ;;  %s5189_s0 = inlined_call_operand.vmem [shape: bf16[128,16], index: 0, kind: input, shape index: {}]   ;;  %s5190_s1 = inlined_call_operand.vmem [shape: bf16[128,32], index: 1, kind: input, shape index: {}]   ;;  %s5191_s2 = inlined_call_operand.vmem [shape: f32[128,8], index: 2, kind: input, shape index: {}]   ;;  %s5192_s3 = inlined_call_operand.vmem [shape: f32[128,16], index: 3, kind: input, shape index: {}]   ;;  %s5193_s4 = inlined_call_operand.vmem [shape: bf16[3,3,32,8], index: 4, kind: input, shape index: {}]   ;;  %s5194_s5 = inlined_call_operand.vmem [shape: bf16[3,3,8,32], index: 5, kind: input, shape index: {}]   ;;  %s5195_s6 = inlined_call_operand.vmem [shape: bf16[16,32], index: 6, kind: input, shape index: {}]   ;;  %s5196_s7 = inlined_call_operand.vmem [shape: bf16[32,16], index: 7, kind: input, shape index: {}]   ;;  %s5197_s8 = inlined_call_operand.hbm [shape: f32[128,16], index: 8, kind: output, shape index: {}]  }
   0x1   :  { %15 = vsyncpa [#allocation5 + $0x1], 0  ;;  %s3959_s27 = smov 0   ;;  %s3961_s28 = smov 0  }
   0x2   :  { %s3963_s29 = smov 0   ;;  %s3965_s30 = smov 0  }
   0x3 LB: > { %s3980_s9 = sadd.s32 4294967295, %s3908_s30   ;;  %s3093_s10 = sadd.s32 4294967294, %s3908_s30   ;;  %s3908_s30 = sphi %s3965_s30, %s5434_s30   ;;  %s3904_s29 = sphi %s3963_s29, %s5433_s29   ;;  %s3900_s28 = sphi %s3961_s28, %s5432_s28   ;;  %s3896_s27 = sphi %s3959_s27, %s5431_s27  }
   0x4   : > { %s3984_s11 = sadd.s32 1, %s3908_s30   ;;  %s216_s12 = sadd.s32 1, %s3904_s29 }
   0x5   : > { %s213_s13 = ssub.s32 %s3908_s30, %s3984_s11  ;;  %p226_p0 = scmp.ne.s32.totalorder %s3904_s29, %s3900_s28 }
   0x6   : > { %p214_p1 = scmp.eq.s32.totalorder %s213_s13, 0  ;;  %p227_p2 = scmp.eq.s32.totalorder %s3980_s9, 1 }
   0x7   : > { %p232_p3 = scmp.ne.s32.totalorder %s3900_s28, %s3896_s27  ;;  %p233_p4 = scmp.eq.s32.totalorder %s3093_s10, 1 }
   0x8   : > { %s3995_s14 = scalar_select %p214_p1, %s3904_s29, %s216_s12  }
   0x9   : > { %p3997_p5 = por %p227_p2, %p226_p0  ;;  %p4001_p6 = por %p233_p4, %p232_p3 }
   0xa   : > { %p3096_p7 = scmp.ge.s32.totalorder %s3908_s30, 1  ;;  %p299_p8 = scmp.lt.s32.totalorder %s3908_s30, 3 }
   0xc   : > { %p300_p9 = pnand %p3096_p7, %p299_p8 }
   0xe   : > { %303 = sbr.rel (%p300_p9) target bundleno = 1028 (0x404), region = 52 }
  0x15   : > { %v3785_v0 = vld [vmem:[%s5193_s4 + $0x10] sm:$0xff]   ;;  %s3098_s19 = sshll.u32 %s3980_s9, 3  ;;  %v3786_v1 = vld [vmem:[%s5193_s4 + $0x18] sm:$0xff]   ;;  %vm5222_vm0 = vcmask 261120   ;;  %vm5217_vm1 = vcmask 64512   ;;  %v3910_v2 = vmov 0.0   ;;  %v374_v4 = vlaneseq }
  0x16   : > { %p349_p10 = scmp.lt.s32.totalorder %s3098_s19, 15  ;;  %3386 = vmatprep.subr.bf16.mxu0 %v3785_v0  ;;  %513 = vst.msk [vmem:[#allocation2 + $0x8] sm:$0xff] %vm5222_vm0, %v3910_v2  ;;  %514 = vst.msk [vmem:[#allocation2 + $0x50] sm:$0xff] %vm5222_vm0, %v3910_v2  ;;  %v3787_v3 = vld [vmem:[%s5193_s4] sm:$0xff]   ;;  %v3788_v32 = vld [vmem:[%s5193_s4 + $0x8] sm:$0xff]   ;;  %v5260_v63 = vmov 0 }
  0x17   : > { %3387 = vmatpush3.bf16.msra.mxu0 %v3785_v0  ;;  %1697 = vst.msk [vmem:[#allocation3 + $0x8] sm:$0xff] %vm5217_vm1, %v3910_v2  ;;  %1698 = vst.msk [vmem:[#allocation3 + $0x50] sm:$0xff] %vm5217_vm1, %v3910_v2  ;;  %v4041_v13 = vshrl.u32 %v374_v4, 7  ;;  %v3789_v39 = vld [vmem:[%s5193_s4 + $0x20] sm:$0xff]   ;;  %v3216_v56 = vld [vmem:[%s5194_s5 + $0x14] sm:$0xf] }
  0x18   : > { %s5436_s19 = smov (!%p349_p10, %s3098_s19), 15  ;;  %3388 = vmatprep.subr.bf16.mxu0 %v3786_v1  ;;  %s345_s23 = sand.u32 1, %s3900_s28  }
  0x19   : > { %s3099_s24 = sshll.u32 %s5436_s19, 2  ;;  %v4072_v18 = vadd.s32 8, %v4041_v13  ;;  %v4077_v20 = vadd.s32 16, %v4041_v13  ;;  %v4082_v22 = vadd.s32 24, %v4041_v13  ;;  %v387_v25 = vand.u32 7, %v4041_v13  ;;  %s3103_s13 = sshll.u32 %s5436_s19, 3 }
  0x1a   : > { %s358_s10 = scalar_lea.vmem %s5190_s1, %s3099_s24  ;;  %v4093_v28 = vadd.s32 32, %v4041_v13  ;;  %v4107_v33 = vadd.s32 40, %v4041_v13  ;;  %vm5220_vm2 = vcmp.lt.s32.totalorder %v4041_v13, 1  ;;  %v4168_v55 = vadd.s32 48, %v4041_v13  ;;  %s4627_s20 = scalar_lea.vmem %s5191_s2, %s3103_s13 }
  0x1b   : > { %3389 = vmatpush3.bf16.msra.mxu0 %v3786_v1  ;;  %v4029_v5 = vld [vmem:[%s358_s10] sm:$0xff]   ;;  %v4031_v6 = vld [vmem:[%s358_s10 + $0x8] sm:$0xff]   ;;  %v4033_v7 = vld [vmem:[%s358_s10 + $0x10] sm:$0xff]   ;;  %v394_v27 = vand.u32 7, %v4072_v18  ;;  %v401_v36 = vand.u32 7, %v4077_v20  ;;  %v408_v37 = vand.u32 7, %v4082_v22  ;;  %s352_s18 = scalar_lea.vmem %s5189_s0, %s3099_s24 }
  0x1c   : > { %5248 = vst [vmem:[#allocation7_spill] sm:$0xff] %v4029_v5  ;;  %5249 = vst [vmem:[#allocation8_spill] sm:$0xff] %v4031_v6  ;;  %v5204_v8 = vunpack.c.l.bf16 %v4029_v5  ;;  %v5202_v9 = vunpack.c.h.bf16 %v4029_v5  ;;  %3398 = vmatprep.subr.bf16.mxu0 %v3787_v3  ;;  %v5205_v10 = vunpack.c.l.bf16 %v4031_v6  ;;  %v5203_v11 = vunpack.c.h.bf16 %v4031_v6  ;;  %v4039_v12 = vld [vmem:[%s358_s10 + $0x18] sm:$0xff]   ;;  %s5099_s10 = scalar_lea.vmem %s5192_s3, %s3103_s13  ;;  %s3097_s12 = sshll.u32 %s345_s23, 6 }
  0x1d   : > { %5250 = vst [vmem:[#allocation9_spill] sm:$0xff] %v4033_v7  ;;  %5251 = vst [vmem:[#allocation10_spill] sm:$0xff] %v4039_v12  ;;  %v5200_v14 = vunpack.c.l.bf16 %v4033_v7  ;;  %v5198_v15 = vunpack.c.h.bf16 %v4033_v7  ;;  %v5201_v16 = vunpack.c.l.bf16 %v4039_v12  ;;  %v5199_v17 = vunpack.c.h.bf16 %v4039_v12  ;;  %v4074_v19 = vld [vmem:[#allocation2 + $0x8] sm:$0xff]  ;;  %s5111_s19 = scalar_lea.vmem [#allocation4], %s3097_s12  ;;  %s3256_s13 = sshll.u32 %s3980_s9, 10 }
  0x1e   : > { %516 = vst.msk [vmem:[#allocation2 + $0x10] sm:$0xff] %vm5222_vm0, %v5204_v8  ;;  %517 = vst.msk [vmem:[#allocation2 + $0x18] sm:$0xff] %vm5222_vm0, %v5202_v9  ;;  %v564_v34 = vrot.slane %v4074_v19, 7  ;;  %vm4121_vm3 = vcmp.gt.s32.totalorder %v387_v25, 0  ;;  %vm4138_vm4 = vcmp.gt.s32.totalorder %v394_v27, 0  ;;  %v5210_v44 = vand.u32 7, %v4093_v28 }
  0x1f   : > { %518 = vst.msk [vmem:[#allocation2 + $0x20] sm:$0xff] %vm5222_vm0, %v5205_v10  ;;  %519 = vst.msk [vmem:[#allocation2 + $0x28] sm:$0xff] %vm5222_vm0, %v5203_v11  ;;  %v5209_v48 = vand.u32 7, %v4107_v33  ;;  %vm4172_vm5 = vcmp.gt.s32.totalorder %v401_v36, 0  ;;  %vm4178_vm6 = vcmp.gt.s32.totalorder %v408_v37, 0  ;;  %v4196_v62 = vadd.s32 56, %v4041_v13 }
  0x20   : > { %520 = vst.msk [vmem:[#allocation2 + $0x30] sm:$0xff] %vm5222_vm0, %v5200_v14  ;;  %521 = vst.msk [vmem:[#allocation2 + $0x38] sm:$0xff] %vm5222_vm0, %v5198_v15  ;;  %vm4200_vm7 = vcmp.gt.s32.totalorder %v5210_v44, 0  ;;  %vm5223_vm9 = vcmp.lt.s32.totalorder %v4041_v13, 7  ;;  %v3790_v15 = vld [vmem:[%s5193_s4 + $0x28] sm:$0xff]   ;;  %vm4270_vm12 = vcmp.lt.s32.totalorder %v387_v25, 7 }
  0x21   : > { %522 = vst.msk [vmem:[#allocation2 + $0x40] sm:$0xff] %vm5222_vm0, %v5201_v16  ;;  %523 = vst.msk [vmem:[#allocation2 + $0x48] sm:$0xff] %vm5222_vm0, %v5199_v17  ;;  %v5261_v63 = vsel %vm4200_vm7, 4294967295, %v5260_v63  ;;  %vm4206_vm8 = vcmp.gt.s32.totalorder %v5209_v48, 0  ;;  %vm4276_vm13 = vcmp.lt.s32.totalorder %v394_v27, 7  ;;  %vm4295_vm14 = vcmp.lt.s32.totalorder %v401_v36, 7 }
  0x22   : > { %v5272_v18 = vmov 0  ;;  %vm4334_vm15 = vcmp.lt.s32.totalorder %v408_v37, 7  ;;  %v5276_v5 = vand.u32 7, %v4093_v28  ;;  %v5277_v6 = vmov 0  ;;  %s2995_s17 = sshll.u32 %s5111_s19, 4  ;;  %s5148_s9 = scalar_lea.sflag [#allocation5], %s345_s23  ;;  %s5138_s17 = int_to_ptr.vmem [resolvable:$true] %s2995_s17 }
  0x23   : > { %v5273_v18 = vsel %vm4295_vm14, 4294967295, %v5272_v18  ;;  %s3846_s21 = scalar_lea.vmem %s5138_s17, 1024  ;;  %s3911_s22 = smov [#allocation4]  }
  0x24   : > { %vm4347_vm1 = vcmp.lt.s32.totalorder %v5276_v5, 7  ;;  %p3847_p11 = scmp.ne.s32.totalorder %s5138_s17, %s3846_s21  ;;  %s3850_s25 = sshll.u32 %s3911_s22, 4  ;;  %s3851_s25 = int_to_ptr.vmem [resolvable:$false] %s3850_s25 }
  0x25   : > { %v4079_v21 = vld [vmem:[#allocation2 + $0x10] sm:$0xff]  ;;  %v4084_v23 = vld [vmem:[#allocation2 + $0x18] sm:$0xff]  ;;  %v5278_v6 = vsel %vm4347_vm1, 4294967295, %v5277_v6  ;;  %s3852_s26 = scalar_lea.vmem %s3851_s25, 2048  ;;  %p3853_p0 = scmp.lt.s32.totalorder %s5138_s17, %s3851_s25 }
  0x26   : > { %v4086_v24 = vld [vmem:[#allocation2 + $0x20] sm:$0xff]  ;;  %v622_v26 = vpack.c.bf16 %v4079_v21, %v4074_v19  ;;  %v4099_v30 = vld [vmem:[#allocation2 + $0x28] sm:$0xff]  ;;  %v4111_v35 = vrot.slane %v4079_v21, 7  ;;  %v4144_v45 = vrot.slane %v4084_v23, 7  ;;  %p3848_p12 = pnand %p3847_p11, %p3997_p5  ;;  %p3854_p1 = scmp.lt.s32.totalorder %s3852_s26, %s3846_s21 }
  0x27   : > { %v4097_v29 = vpack.c.bf16 %v4086_v24, %v4084_v23  ;;  %v4101_v31 = vld [vmem:[#allocation2 + $0x30] sm:$0xff]  ;;  %v4132_v41 = vld [vmem:[#allocation2 + $0x38] sm:$0xff]  ;;  %v567_v46 = vrot.slane %v4086_v24, 7  ;;  %v568_v49 = vrot.slane %v4099_v30, 7  ;;  %v592_v27 = vrot.slane %v4086_v24, 1 }
  0x28   : > { %3390 = vmatprep.mubr.msk.bf16.mxu0 %vm5222_vm0, %v622_v26  ;;  %v4130_v40 = vpack.c.bf16 %v4101_v31, %v4099_v30  ;;  %v4134_v42 = vld [vmem:[#allocation2 + $0x40] sm:$0xff]  ;;  %v569_v50 = vrot.slane %v4101_v31, 7  ;;  %v579_v51 = vsel %vm5220_vm2, %v564_v34, %v4111_v35  ;;  %v4193_v60 = vsel %vm5220_vm2, %v4111_v35, %v4144_v45  ;;  %p3849_p13 = pneg %p3848_p12  ;;  %p3855_p2 = por %p3854_p1, %p3853_p0 }
  0x29   : > { %3391 = vmatmul.mubr.msk.bf16.vlgmr.msra.gmra.mrb[0].mxu0 %vm5222_vm0, %v4097_v29  ;;  %v4148_v47 = vrot.slane %v4134_v42, 7  ;;  %v4160_v52 = vpack.c.bf16 %v4134_v42, %v4132_v41  ;;  %v582_v54 = vsel %vm4138_vm4, %v579_v51, 0.0  ;;  %v4187_v59 = vsel %vm5220_vm2, %v4144_v45, %v567_v46 }
  0x2a   : > { %3399 = vmatpush3.bf16.msra.mxu0 %v3787_v3  ;;  %3394 = vmatprep.mubr.msk.bf16.mxu0 %vm5222_vm0, %v4130_v40  ;;  %v4212_v1 = vsel %vm5220_vm2, %v568_v49, %v569_v50  ;;  %v4216_v2 = vsel %vm5220_vm2, %v567_v46, %v568_v49  ;;  %v5208_v3 = vand.u32 7, %v4168_v55  ;;  %v583_v4 = vsel %vm4172_vm5, %v4193_v60, 0.0  ;;  %p3856_p3 = pnand %p3855_p2, %p3849_p13 }
  0x2b   : > { %3400 = vmatprep.subr.bf16.mxu0 %v3788_v32  ;;  %v580_v53 = vsel %vm5220_vm2, %v4148_v47, %v564_v34  ;;  %v584_v26 = vsel %vm4178_vm6, %v4187_v59, 0.0  ;;  %v585_v34 = vsel %vm4200_vm7, %v4216_v2, 0.0  ;;  %v586_v46 = vsel %vm4206_vm8, %v4212_v1, 0.0 }
  0x2c   : > { %v581_v58 = vsel %vm4121_vm3, %v580_v53, 0.0  ;;  %v5207_v49 = vand.u32 7, %v4196_v62  ;;  %v5206_v51 = vrot.slane %v4074_v19, 1  ;;  %v4238_v53 = vrot.slane %v4079_v21, 1 }
  0x2d   : > { %v614_v61 = vpack.c.bf16 %v582_v54, %v581_v58  ;;  %v4241_v54 = vrot.slane %v4084_v23, 1  ;;  %v615_v58 = vpack.c.bf16 %v584_v26, %v583_v4  ;;  %vm4249_vm10 = vcmp.gt.s32.totalorder %v5208_v3, 0 }
  0x2e   : > { %3401 = vmatpush3.bf16.msra.mxu0 %v3788_v32  ;;  %v570_v32 = vrot.slane %v4132_v41, 7  ;;  %vm4255_vm11 = vcmp.gt.s32.totalorder %v5207_v49, 0  ;;  %v604_v25 = vsel %vm5223_vm9, %v5206_v51, %v4238_v53  ;;  %v594_v9 = vrot.slane %v4101_v31, 1 }
  0x2f   : > { %3410 = vmatprep.subr.bf16.mxu0 %v3789_v39  ;;  %v4284_v16 = vsel %vm5223_vm9, %v4238_v53, %v4241_v54  ;;  %v595_v36 = vrot.slane %v4132_v41, 1  ;;  %v1314_v10 = vsel %vm4138_vm4, %v4187_v59, 0.0  ;;  %v1315_v51 = vsel %vm4172_vm5, %v4216_v2, 0.0 }
  0x30   : > { %v4262_v4 = vsel %vm5220_vm2, %v570_v32, %v4148_v47  ;;  %v4266_v26 = vsel %vm5220_vm2, %v569_v50, %v570_v32  ;;  %v4291_v50 = vld [vmem:[#allocation2 + $0x50] sm:$0xff]  ;;  %v593_v32 = vrot.slane %v4099_v30, 1  ;;  %v5274_v3 = vmov 0 }
  0x31   : > { %3395 = vmatmul.mubr.msk.bf16.gmra.mrb[4].mxu0 %vm5222_vm0, %v4160_v52  ;;  %v587_v11 = vsel %vm4249_vm10, %v4266_v26, 0.0  ;;  %v588_v20 = vsel %vm4255_vm11, %v4262_v4, 0.0  ;;  %v5221_v8 = vrot.slane %v4291_v50, 7  ;;  %v1317_v49 = vsel %vm4200_vm7, %v4266_v26, 0.0 }
  0x32   : > { %3402 = vmatprep.mubr.msk.bf16.mxu0 %vm5222_vm0, %v614_v61  ;;  %v616_v61 = vpack.c.bf16 %v586_v46, %v585_v34  ;;  %v5268_v34 = vmov 0  ;;  %v5270_v46 = vmov 0  ;;  %v5275_v3 = vsel %vm4334_vm15, 4294967295, %v5274_v3 }
  0x33   : > { %v5269_v34 = vsel %vm4270_vm12, 4294967295, %v5268_v34  ;;  %v5271_v46 = vsel %vm4276_vm13, 4294967295, %v5270_v46  ;;  %v617_v48 = vpack.c.bf16 %v588_v20, %v587_v11  ;;  %v1312_v44 = vsel %vm5220_vm2, %v5221_v8, %v4144_v45 }
  0x34   : > { %v1313_v22 = vsel %vm4121_vm3, %v1312_v44, 0.0  ;;  %v1318_v11 = vsel %vm4206_vm8, %v4262_v4, 0.0  ;;  %v4359_v37 = vsel %vm5223_vm9, %v4241_v54, %v592_v27  ;;  %v5279_v44 = vand.u32 7, %v4107_v33 }
  0x35   : > { %v4365_v5 = vpack.c.bf16 %v1314_v10, %v1313_v22  ;;  %v4367_v28 = vpack.c.bf16 %v1318_v11, %v1317_v49  ;;  %v5280_v45 = vmov 0  ;;  %v4381_v20 = vsel %vm5223_vm9, %v593_v32, %v594_v9  ;;  %v4387_v49 = vld [vmem:[#allocation2 + $0x48] sm:$0xff] }
  0x36   : > { %vm4371_vm2 = vcmp.lt.s32.totalorder %v5279_v44, 7  ;;  %v1337_v10 = vsel %vm4270_vm12, %v4359_v37, 0.0  ;;  %v610_v22 = vsel %vm4347_vm1, %v4381_v20, 0.0  ;;  %v4419_v44 = vrot.slane %v4387_v49, 7 }
  0x37   : > { %v5281_v45 = vsel %vm4371_vm2, 4294967295, %v5280_v45 }
  0x39   : > { %3403 = vmatmul.mubr.msk.bf16.vlgmr.msra.gmra.mrb[0].mxu0 %vm5222_vm0, %v615_v58  ;;  %v606_v58 = vsel %vm4270_vm12, %v604_v25, 0.0  ;;  %v1316_v25 = vsel %vm4178_vm6, %v4212_v1, 0.0 }
  0x3a   : > { %3411 = vmatpush3.bf16.msra.mxu0 %v3789_v39  ;;  %3406 = vmatprep.mubr.msk.bf16.mxu0 %vm5222_vm0, %v616_v61  ;;  %v607_v39 = vsel %vm4276_vm13, %v4284_v16, 0.0  ;;  %v3791_v61 = vld [vmem:[%s5193_s4 + $0x30] sm:$0xff]   ;;  %v4343_v7 = vpack.c.bf16 %v1316_v25, %v1315_v51  ;;  %v4377_v51 = vsel %vm5223_vm9, %v594_v9, %v595_v36  ;;  %v4410_v25 = vrot.slane %v4134_v42, 1 }
  0x3b   : > { %3412 = vmatprep.subr.bf16.mxu0 %v3790_v15  ;;  %v809_v12 = vpack.c.bf16 %v607_v39, %v606_v58  ;;  %v1340_v9 = vsel %vm4334_vm15, %v4377_v51, 0.0  ;;  %v611_v11 = vsel %vm4371_vm2, %v4377_v51, 0.0  ;;  %vm5289_vm2 = vcmp.lt.s32.totalorder %v4041_v13, 7 }
  0x3c   : > { %vm5291_vm1 = vmmov %vm5289_vm2 }
  0x3e   : > { %3413 = vmatpush3.bf16.msra.mxu0 %v3790_v15  ;;  %v4363_v15 = vsel %vm5223_vm9, %v592_v27, %v593_v32  ;;  %v1339_v27 = vsel %vm4295_vm14, %v4381_v20, 0.0  ;;  %v608_v32 = vsel %vm4295_vm14, %v4359_v37, 0.0  ;;  %vm5293_vm14 = vcmask 261120  }
  0x3f   : > { %3422 = vmatprep.subr.bf16.mxu0 %v3791_v61  ;;  %v1338_v33 = vsel %vm4276_vm13, %v4363_v15, 0.0  ;;  %v4407_v39 = vpack.c.bf16 %v1340_v9, %v1339_v27  ;;  %v5286_v9 = vand.u32 7, %v4196_v62  ;;  %vm5294_vm13 = vmmov %vm5293_vm14  ;;  %v3809_v27 = vld [vmem:[%s5196_s7 + $0x8] sm:$0xff]  }
  0x40   : > { %v4405_v58 = vpack.c.bf16 %v1338_v33, %v1337_v10  ;;  %v3792_v10 = vld [vmem:[%s5193_s4 + $0x38] sm:$0xff]   ;;  %v5283_v33 = vand.u32 7, %v4168_v55 }
  0x41   : > { %3407 = vmatmul.mubr.msk.bf16.gmra.mrb[4].mxu0 %vm5222_vm0, %v617_v48  ;;  %v609_v48 = vsel %vm4334_vm15, %v4363_v15, 0.0  ;;  %5282 = vst [vmem:[#allocation11_spill] sm:$0xff] %v4407_v39  ;;  %vm4432_vm9 = vcmp.lt.s32.totalorder %v5286_v9, 7  ;;  %v5287_v39 = vmov 0  ;;  %vm5292_vm15 = vcmp.lt.s32.totalorder %v4041_v13, 1 }
  0x42   : > { %3414 = vmatprep.mubr.msk.bf16.mxu0 %vm5222_vm0, %v809_v12  ;;  %v810_v8 = vpack.c.bf16 %v609_v48, %v608_v32  ;;  %v811_v12 = vpack.c.bf16 %v611_v11, %v610_v22  ;;  %vm4426_vm0 = vcmp.lt.s32.totalorder %v5283_v33, 7  ;;  %v5288_v39 = vsel %vm4432_vm9, 4294967295, %v5287_v39 }
  0x43   : > { %v4439_v32 = vsel %vm5289_vm2, %v595_v36, %v4410_v25  ;;  %v5290_v48 = vrot.slane %v4074_v19, 1  ;;  %v938_v62 = vsel %vm5292_vm15, %v4419_v44, %v4111_v35  ;;  %v940_v35 = vsel %vm4138_vm4, %v4193_v60, 0.0 }
  0x44   : > { %v612_v36 = vsel %vm4426_vm0, %v4439_v32, 0.0  ;;  %v939_v22 = vsel %vm4121_vm3, %v938_v62, 0.0  ;;  %v942_v60 = vsel %vm4178_vm6, %v4216_v2, 0.0  ;;  %v943_v33 = vsel %vm4200_vm7, %v4212_v1, 0.0 }
  0x45   : > { %v605_v55 = vsel %vm5291_vm1, %v4410_v25, %v5290_v48  ;;  %v971_v11 = vpack.c.bf16 %v940_v35, %v939_v22  ;;  %vm5295_vm1 = vmmov %vm5294_vm13  ;;  %v945_v1 = vsel %vm4249_vm10, %v4262_v4, 0.0  ;;  %v1078_v4 = vpack.c.bf16 %v4099_v30, %v4086_v24  ;;  %v3797_v24 = vld [vmem:[%s5193_s4 + $0x60] sm:$0xff]  }
  0x46   : > { %v613_v19 = vsel %vm4432_vm9, %v605_v55, 0.0  ;;  %vm5296_vm2 = vmmov %vm5295_vm1  ;;  %v3794_v55 = vld [vmem:[%s5193_s4 + $0x48] sm:$0xff]   ;;  %v1080_v30 = vpack.c.bf16 %v4387_v49, %v4134_v42  ;;  %v954_v22 = vrot.slane %v4387_v49, 1 }
  0x49   : > { %3415 = vmatmul.mubr.msk.bf16.vlgmr.msra.gmra.mrb[0].mxu0 %vm5293_vm14, %v810_v8  ;;  %v3793_v8 = vld [vmem:[%s5193_s4 + $0x40] sm:$0xff]   ;;  %vm5298_vm14 = vmmov %vm5295_vm1 }
  0x4a   : > { %3423 = vmatpush3.bf16.msra.mxu0 %v3791_v61  ;;  %3418 = vmatprep.mubr.msk.bf16.mxu0 %vm5294_vm13, %v811_v12  ;;  %v812_v61 = vpack.c.bf16 %v613_v19, %v612_v36  ;;  %v941_v12 = vsel %vm4172_vm5, %v4187_v59, 0.0  ;;  %vm5297_vm13 = vmmov %vm5292_vm15  ;;  %v1079_v36 = vpack.c.bf16 %v4132_v41, %v4101_v31  ;;  %v3796_v19 = vld [vmem:[%s5193_s4 + $0x58] sm:$0xff]  }
  0x4b   : > { %3424 = vmatprep.subr.bf16.mxu0 %v3792_v10  ;;  %v972_v9 = vpack.c.bf16 %v942_v60, %v941_v12  ;;  %v931_v59 = vsel %vm5297_vm13, %v4148_v47, %v4419_v44  ;;  %vm5299_vm15 = vmmov %vm5295_vm1  ;;  %v1077_v47 = vpack.c.bf16 %v4084_v23, %v4079_v21  ;;  %v963_v21 = vsel %vm4270_vm12, %v4284_v16, 0.0 }
  0x4c   : > { %v946_v2 = vsel %vm4255_vm11, %v931_v59, 0.0  ;;  %vm5301_vm13 = vmmov %vm5295_vm1  ;;  %vm5307_vm12 = vnez %v5278_v6  ;;  %v5315_v60 = vrot.slane %v4291_v50, 7 }
  0x4d   : > { %v974_v62 = vpack.c.bf16 %v946_v2, %v945_v1  ;;  %v3192_v1 = vld [vmem:[%s5194_s5 + $0x4] sm:$0xf]  ;;  %v4617_v2 = vld [vmem:[%s5194_s5] sm:$0xf] }
  0x4e   : > { %3425 = vmatpush3.bf16.msra.mxu0 %v3792_v10  ;;  %v944_v10 = vsel %vm4206_vm8, %v4266_v26, 0.0  ;;  %v3795_v26 = vld [vmem:[%s5193_s4 + $0x50] sm:$0xff]  }
  0x4f   : > { %3434 = vmatprep.subr.bf16.mxu0 %v3793_v8  ;;  %v973_v48 = vpack.c.bf16 %v944_v10, %v943_v33 }
  0x51   : > { %3419 = vmatmul.mubr.msk.bf16.gmra.mrb[4].mxu0 %vm5295_vm1, %v812_v61 }
  0x52   : > { %3426 = vmatprep.mubr.msk.bf16.mxu0 %vm5296_vm2, %v971_v11  ;;  %vm5300_vm2 = vmmov %vm5295_vm1 }
  0x59   : > { %3427 = vmatmul.mubr.msk.bf16.vlgmr.msra.gmra.mrb[0].mxu0 %vm5298_vm14, %v972_v9  ;;  %vm5302_vm14 = vmmov %vm5295_vm1  ;;  %v3801_v9 = vld [vmem:[%s5193_s4 + $0x80] sm:$0xff]  }
  0x5a   : > { %3435 = vmatpush3.bf16.msra.mxu0 %v3793_v8  ;;  %3430 = vmatprep.mubr.msk.bf16.mxu0 %vm5299_vm15, %v973_v48  ;;  %vm5303_vm15 = vnez %v5271_v46 }
  0x5b   : > { %3436 = vmatprep.subr.bf16.mxu0 %v3794_v55  ;;  %v964_v23 = vsel %vm5303_vm15, %v4359_v37, 0.0  ;;  %v967_v37 = vsel %vm5307_vm12, %v4377_v51, 0.0  ;;  %vm5308_vm15 = vnez %v5281_v45 }
  0x5c   : > { %v1183_v31 = vpack.c.bf16 %v964_v23, %v963_v21  ;;  %v968_v42 = vsel %vm5308_vm15, %v4439_v32, 0.0 }
  0x5d   : > { %v1185_v8 = vpack.c.bf16 %v968_v42, %v967_v37  ;;  %v1665_v37 = vld [vmem:[%s4627_s20 + $0x10] sm:$0xff] }
  0x5e   : > { %3437 = vmatpush3.bf16.msra.mxu0 %v3794_v55 }
  0x5f   : > { %3446 = vmatprep.subr.bf16.mxu0 %v3795_v26 }
  0x61   : > { %3431 = vmatmul.mubr.msk.bf16.gmra.mrb[4].mxu0 %vm5295_vm1, %v974_v62 }
  0x62   : > { %3438 = vmatprep.mubr.msk.bf16.mxu0 %vm5300_vm2, %v1077_v47  ;;  %vm5304_vm2 = vmmov %vm5295_vm1 }
  0x69   : > { %3439 = vmatmul.mubr.msk.bf16.vlgmr.msra.gmra.mrb[0].mxu0 %vm5301_vm13, %v1078_v4  ;;  %vm5305_vm13 = vnez %v5273_v18 }
  0x6a   : > { %3447 = vmatpush3.bf16.msra.mxu0 %v3795_v26  ;;  %3442 = vmatprep.mubr.msk.bf16.mxu0 %vm5302_vm14, %v1079_v36  ;;  %v965_v16 = vsel %vm5305_vm13, %v4363_v15, 0.0  ;;  %vm5306_vm14 = vnez %v5275_v3  ;;  %v3798_v15 = vld [vmem:[%s5193_s4 + $0x68] sm:$0xff]  }
  0x6b   : > { %3448 = vmatprep.subr.bf16.mxu0 %v3796_v19  ;;  %v966_v41 = vsel %vm5306_vm14, %v4381_v20, 0.0  ;;  %vm5311_vm14 = vcmask 261120  }
  0x6c   : > { %v1184_v35 = vpack.c.bf16 %v966_v41, %v965_v16  ;;  %vm5312_vm13 = vmmov %vm5311_vm14 }
  0x6e   : > { %3449 = vmatpush3.bf16.msra.mxu0 %v3796_v19 }
  0x6f   : > { %3458 = vmatprep.subr.bf16.mxu0 %v3797_v24 }
  0x71   : > { %3443 = vmatmul.mubr.msk.bf16.gmra.mrb[4].mxu0 %vm5295_vm1, %v1080_v30  ;;  %vm5309_vm1 = vcmp.lt.s32.totalorder %v4041_v13, 7 }
  0x72   : > { %3450 = vmatprep.mubr.msk.bf16.mxu0 %vm5304_vm2, %v1183_v31  ;;  %v955_v20 = vsel %vm5309_vm1, %v4410_v25, %v954_v22  ;;  %vm5310_vm2 = vmmov %vm5309_vm1  ;;  %v3799_v25 = vld [vmem:[%s5193_s4 + $0x70] sm:$0xff]  }
  0x73   : > { %v962_v51 = vsel %vm5310_vm2, %v954_v22, %v4238_v53  ;;  %v969_v61 = vsel %vm4426_vm0, %v955_v20, 0.0  ;;  %vm5313_vm1 = vmmov %vm5312_vm13  ;;  %v3800_v53 = vld [vmem:[%s5193_s4 + $0x78] sm:$0xff]  }
  0x74   : > { %v970_v11 = vsel %vm4432_vm9, %v962_v51, 0.0  ;;  %vm5317_vm2 = vmmov %vm5313_vm1 }
  0x75   : > { %v1186_v12 = vpack.c.bf16 %v970_v11, %v969_v61  ;;  %vm5318_vm7 = vmmov %vm5313_vm1  ;;  %v1664_v11 = vld [vmem:[%s4627_s20 + $0x8] sm:$0xff] }
  0x79   : > { %3451 = vmatmul.mubr.msk.bf16.vlgmr.msra.gmra.mrb[0].mxu0 %vm5311_vm14, %v1184_v35  ;;  %vm5314_vm14 = vmmov %vm5313_vm1  ;;  %v1663_v35 = vld [vmem:[%s4627_s20] sm:$0xff] }
  0x7a   : > { %3459 = vmatpush3.bf16.msra.mxu0 %v3797_v24  ;;  %3454 = vmatprep.mubr.msk.bf16.mxu0 %vm5312_vm13, %v1185_v8  ;;  %vm5316_vm13 = vcmp.lt.s32.totalorder %v4041_v13, 1 }
  0x7b   : > { %3460 = vmatprep.subr.bf16.mxu0 %v3798_v15  ;;  %v1305_v33 = vsel %vm5316_vm13, %v4419_v44, %v5315_v60  ;;  %vm5321_vm13 = vmmov %vm5313_vm1  ;;  %v1328_v44 = vrot.slane %v4291_v50, 1 }
  0x7c   : > { %v1320_v10 = vsel %vm4255_vm11, %v1305_v33, 0.0 }
  0x7e   : > { %3461 = vmatpush3.bf16.msra.mxu0 %v3798_v15 }
  0x7f   : > { %3470 = vmatprep.subr.bf16.mxu0 %v3799_v25 }
  0x81   : > { %3455 = vmatmul.mubr.msk.bf16.gmra.mrb[4].mxu0 %vm5313_vm1, %v1186_v12 }
  0x82   : > { %3462 = vmatprep.mubr.msk.bf16.mxu0 %vm5314_vm14, %v4365_v5  ;;  %v1319_v5 = vsel %vm4249_vm10, %v931_v59, 0.0  ;;  %vm5319_vm14 = vmmov %vm5313_vm1  ;;  %v5325_v59 = vld [vmem:[#allocation11_spill] sm:$0xff] }
  0x83   : > { %v1348_v48 = vpack.c.bf16 %v1320_v10, %v1319_v5  ;;  %v1669_v5 = vld [vmem:[%s4627_s20 + $0x30] sm:$0xff]  ;;  %v1667_v10 = vld [vmem:[%s4627_s20 + $0x20] sm:$0xff] }
  0x89   : > { %3463 = vmatmul.mubr.msk.bf16.vlgmr.msra.gmra.mrb[0].mxu0 %vm5317_vm2, %v4343_v7  ;;  %v3802_v7 = vld [vmem:[%s5193_s4 + $0x88] sm:$0xff]   ;;  %vm5322_vm2 = vmmov %vm5313_vm1 }
  0x8a   : > { %3471 = vmatpush3.bf16.msra.mxu0 %v3799_v25  ;;  %3466 = vmatprep.mubr.msk.bf16.mxu0 %vm5318_vm7, %v4367_v28  ;;  %vm5320_vm7 = vmmov %vm5313_vm1  ;;  %v1454_v28 = vpack.c.bf16 %v4291_v50, %v4387_v49 }
  0x8b   : > { %3472 = vmatprep.subr.bf16.mxu0 %v3800_v53 }
  0x8e   : > { %3473 = vmatpush3.bf16.msra.mxu0 %v3800_v53 }
  0x8f   : > { %3482 = vmatprep.subr.bf16.mxu0 %v3801_v9 }
  0x91   : > { %3467 = vmatmul.mubr.msk.bf16.gmra.mrb[4].mxu0 %vm5313_vm1, %v1348_v48  ;;  %v1670_v48 = vld [vmem:[%s4627_s20 + $0x38] sm:$0xff] }
  0x92   : > { %3474 = vmatprep.mubr.msk.bf16.mxu0 %vm5319_vm14, %v4097_v29  ;;  %v1341_v29 = vsel %vm5307_vm12, %v4439_v32, 0.0  ;;  %vm5323_vm14 = vcmp.lt.s32.totalorder %v4041_v13, 7 }
  0x93   : > { %v1329_v55 = vsel %vm5323_vm14, %v954_v22, %v1328_v44 }
  0x99   : > { %3475 = vmatmul.mubr.msk.bf16.vlgmr.msra.gmra.mrb[0].mxu0 %vm5320_vm7, %v4130_v40  ;;  %v1342_v40 = vsel %vm5308_vm15, %v955_v20, 0.0  ;;  %vm5324_vm7 = vmmov %vm5323_vm14  ;;  %vm5238_vm14 = vcmask 1043456   ;;  %v1666_v20 = vld [vmem:[%s4627_s20 + $0x18] sm:$0xff] }
  0x9a   : > { %3483 = vmatpush3.bf16.msra.mxu0 %v3801_v9  ;;  %3478 = vmatprep.mubr.msk.bf16.mxu0 %vm5321_vm13, %v4160_v52  ;;  %v1559_v52 = vpack.c.bf16 %v1342_v40, %v1341_v29  ;;  %v1336_v49 = vsel %vm5324_vm7, %v1328_v44, %v4241_v54  ;;  %vm5326_vm13 = vmmov %vm5313_vm1  ;;  %v1789_v54 = vsel %vm5238_vm14, %v3192_v1, 0  ;;  %vm5328_vm7 = vcmask 64512   ;;  %v1668_v29 = vld [vmem:[%s4627_s20 + $0x28] sm:$0xff]  ;;  %s5136_s20 = scalar_lea.hbm %s5197_s8, %s3256_s13 }
  0x9b   : > { %3484 = vmatprep.subr.bf16.mxu0 %v3802_v7  ;;  %v1344_v32 = vsel %vm4432_vm9, %v1336_v49, 0.0  ;;  %3734 = vmatprep.subr.msk.bf16.mxu1 %vm5238_vm14, %v3192_v1  ;;  %v4641_v40 = vld [vmem:[#allocation3 + $0x8] sm:$0xff] }
  0x9c   : > { %3495 = vmatpush3.bf16.msra.mxu1 %v1789_v54 }
  0x9d   : > { %3735 = vmatprep.subr.msk.bf16.mxu1 %vm5238_vm14, %v4617_v2 }
  0x9e   : > { %3485 = vmatpush3.bf16.msra.mxu0 %v3802_v7 }
  0xa1   : > { %3479 = vmatmul.mubr.msk.bf16.gmra.mrb[4].mxu0 %vm5322_vm2, %v1454_v28  ;;  %vm5327_vm2 = vmmov %vm5313_vm1 }
  0xa2   : > { %3486 = vmatprep.mubr.msk.bf16.mxu0 %vm5313_vm1, %v4405_v58  ;;  %v1343_v58 = vsel %vm4426_vm0, %v1329_v55, 0.0 }
  0xa3   : > { %v1560_v50 = vpack.c.bf16 %v1344_v32, %v1343_v58 }
  0xa9   : > { %3487 = vmatmul.mubr.msk.bf16.vlgmr.msra.gmra.mrb[0].mxu0 %vm5326_vm13, %v5325_v59  ;;  %vm5329_vm13 = vmmov %vm5328_vm7 }
  0xaa   : > { %3490 = vmatprep.mubr.msk.bf16.mxu0 %vm5327_vm2, %v1559_v52  ;;  %vm5330_vm2 = vmmov %vm5328_vm7 }
  0xb1   : > { %3491 = vmatmul.mubr.msk.bf16.gmra.mrb[4].mxu0 %vm5313_vm1, %v1560_v50  ;;  %vm5331_vm1 = vmmov %vm5330_vm2 }
  0xb2   : > { %vm5335_vm14 = vmmov %vm5331_vm1 }
 0x17c   : > { %v3488_v26 = vpop.f32.mrb[0].mxu0 }
 0x17d   : > { %v1673_v62 = vadd.f32 1e-05, %v3488_v26  ;;  %v1624_v47 = vpop.f32.mrb[1].mxu0 }
 0x17e   : > { %v1671_v4 = vadd.f32 1e-05, %v1624_v47  ;;  %v3489_v36 = vpop.f32.mrb[2].mxu0 }
 0x17f   : > { %3814 = vrcp.f32 %v1673_v62  ;;  %v1674_v19 = vadd.f32 1e-05, %v3489_v36  ;;  %v1627_v21 = vpop.f32.mrb[3].mxu0  ;;  %v1716_v62 = vrot.slane %v4641_v40, 7 }
 0x180   : > { %3816 = vrcp.f32 %v1671_v4  ;;  %v1672_v23 = vadd.f32 1e-05, %v1627_v21  ;;  %v3201_v4 = vld [vmem:[%s5194_s5 + $0x8] sm:$0xf] }
 0x181   : > { %3818 = vrcp.f32 %v1674_v19 }
 0x182   : > { %3820 = vrcp.f32 %v1672_v23 }
 0x184   : > { %v3492_v24 = vpop.f32.mrb[4].mxu0 }
 0x185   : > { %v1677_v30 = vadd.f32 1e-05, %v3492_v24  ;;  %v1640_v31 = vpop.f32.mrb[5].mxu0 }
 0x186   : > { %v1675_v16 = vadd.f32 1e-05, %v1640_v31  ;;  %v3493_v41 = vpop.f32.mrb[6].mxu0 }
 0x187   : > { %3822 = vrcp.f32 %v1677_v30  ;;  %v1678_v42 = vadd.f32 1e-05, %v3493_v41  ;;  %v1643_v22 = vpop.f32.mrb[7].mxu0 }
 0x188   : > { %3824 = vrcp.f32 %v1675_v16  ;;  %v1676_v8 = vadd.f32 1e-05, %v1643_v22 }
 0x189   : > { %v3815_v15 = vpop.eup %3814  ;;  %3826 = vrcp.f32 %v1678_v42 }
 0x18a   : > { %v3817_v51 = vpop.eup %3816  ;;  %v1689_v61 = vmul.f32 %v3815_v15, %v1665_v37  ;;  %3828 = vrcp.f32 %v1676_v8 }
 0x18b   : > { %v3819_v25 = vpop.eup %3818  ;;  %v1687_v12 = vmul.f32 %v3817_v51, %v1663_v35 }
 0x18c   : > { %v3821_v53 = vpop.eup %3820  ;;  %1702 = vst.msk [vmem:[#allocation3 + $0x20] sm:$0xff] %vm5328_vm7, %v1689_v61  ;;  %v1690_v60 = vmul.f32 %v3819_v25, %v1666_v20  ;;  %vm5332_vm7 = vmmov %vm5331_vm1  ;;  %v4726_v25 = vld [vmem:[#allocation3 + $0x50] sm:$0xff] }
 0x18d   : > { %1700 = vst.msk [vmem:[#allocation3 + $0x10] sm:$0xff] %vm5329_vm13, %v1687_v12  ;;  %v1688_v33 = vmul.f32 %v3821_v53, %v1664_v11  ;;  %vm5333_vm13 = vmmov %vm5331_vm1 }
 0x18e   : > { %1703 = vst.msk [vmem:[#allocation3 + $0x28] sm:$0xff] %vm5330_vm2, %v1690_v60  ;;  %vm5334_vm2 = vmmov %vm5331_vm1 }
 0x18f   : > { %1701 = vst.msk [vmem:[#allocation3 + $0x18] sm:$0xff] %vm5331_vm1, %v1688_v33 }
 0x191   : > { %v3823_v9 = vpop.eup %3822 }
 0x192   : > { %v3825_v7 = vpop.eup %3824  ;;  %v1693_v28 = vmul.f32 %v3823_v9, %v1669_v5 }
 0x193   : > { %v3827_v44 = vpop.eup %3826  ;;  %v1691_v52 = vmul.f32 %v3825_v7, %v1667_v10  ;;  %v4652_v1 = vld [vmem:[#allocation3 + $0x20] sm:$0xff] }
 0x194   : > { %v3829_v55 = vpop.eup %3828  ;;  %1706 = vst.msk [vmem:[#allocation3 + $0x40] sm:$0xff] %vm5332_vm7, %v1693_v28  ;;  %v1694_v49 = vmul.f32 %v3827_v44, %v1670_v48  ;;  %v4644_v59 = vld [vmem:[#allocation3 + $0x10] sm:$0xff]  ;;  %vm5336_vm7 = vcmask 1043456   ;;  %v1719_v37 = vrot.slane %v4652_v1, 7  ;;  %v1740_v48 = vrot.slane %v4641_v40, 1 }
 0x195   : > { %1704 = vst.msk [vmem:[#allocation3 + $0x30] sm:$0xff] %vm5333_vm13, %v1691_v52  ;;  %v1692_v58 = vmul.f32 %v3829_v55, %v1668_v29  ;;  %v1769_v32 = vpack.c.bf16 %v4644_v59, %v4641_v40  ;;  %v1869_v26 = vsel %vm5336_vm7, %v4617_v2, 0  ;;  %v4664_v47 = vrot.slane %v4644_v59, 7  ;;  %vm5337_vm13 = vmmov %vm5331_vm1  ;;  %v4674_v19 = vld [vmem:[#allocation3 + $0x28] sm:$0xff] }
 0x196   : > { %1707 = vst.msk [vmem:[#allocation3 + $0x48] sm:$0xff] %vm5334_vm2, %v1694_v49  ;;  %v4650_v50 = vld [vmem:[#allocation3 + $0x18] sm:$0xff]  ;;  %vm5339_vm2 = vcmp.lt.s32.totalorder %v4041_v13, 1  ;;  %v1720_v8 = vrot.slane %v4674_v19, 7  ;;  %v1744_v60 = vrot.slane %v4674_v19, 1  ;;  %v4740_v5 = vrot.slane %v4644_v59, 1 }
 0x197   : > { %1705 = vst.msk [vmem:[#allocation3 + $0x38] sm:$0xff] %vm5331_vm1, %v1692_v58  ;;  %3496 = vmatprep.mubr.msk.bf16.mxu1 %vm5335_vm14, %v1769_v32  ;;  %v4658_v54 = vpack.c.bf16 %v4652_v1, %v4650_v50  ;;  %vm5338_vm14 = vmmov %vm5336_vm7  ;;  %v1730_v23 = vsel %vm5339_vm2, %v1716_v62, %v4664_v47  ;;  %v1718_v24 = vrot.slane %v4650_v50, 7  ;;  %v4724_v11 = vrot.slane %v4650_v50, 1  ;;  %v3206_v32 = vld [vmem:[%s5194_s5 + $0xc] sm:$0xf] }
 0x198   : > { %vm5340_vm1 = vmmov %vm5339_vm2  ;;  %v1733_v35 = vsel %vm4138_vm4, %v1730_v23, 0.0  ;;  %v1743_v7 = vrot.slane %v4652_v1, 1  ;;  %v5243_v28 = vrot.slane %v4726_v25, 7 }
 0x199   : > { %3497 = vmatmul.mubr.msk.bf16.vlgmr.msra.gmra.mrb[0].mxu1 %vm5337_vm13, %v4658_v54  ;;  %vm5341_vm7 = vmmov %vm5337_vm13 }
 0x19a   : > { %3505 = vmatpush3.bf16.msra.mxu1 %v1869_v26  ;;  %vm5342_vm13 = vmmov %vm5340_vm1 }
 0x19b   : > { %v4671_v36 = vld [vmem:[#allocation3 + $0x40] sm:$0xff]  ;;  %3736 = vmatprep.subr.msk.bf16.mxu1 %vm5338_vm14, %v3201_v4  ;;  %v4709_v20 = vsel %vm5342_vm13, %v1718_v24, %v1719_v37  ;;  %vm5343_vm14 = vmmov %vm5340_vm1 }
 0x19c   : > { %v4676_v2 = vld [vmem:[#allocation3 + $0x30] sm:$0xff]  ;;  %v4679_v21 = vrot.slane %v4671_v36, 7  ;;  %v4714_v51 = vsel %vm5343_vm14, %v4664_v47, %v1718_v24  ;;  %vm5344_vm2 = vmmov %vm5341_vm7  ;;  %v1735_v53 = vsel %vm4178_vm6, %v4709_v20, 0.0  ;;  %vm5348_vm14 = vcmask 1043456  }
 0x19d   : > { %v4687_v30 = vpack.c.bf16 %v4676_v2, %v4674_v19  ;;  %v1721_v31 = vrot.slane %v4676_v2, 7  ;;  %v1734_v12 = vsel %vm4172_vm5, %v4714_v51, 0.0  ;;  %v1955_v44 = vsel %vm5348_vm14, %v3201_v4, 0 }
 0x19e   : > { %v4690_v16 = vld [vmem:[#allocation3 + $0x38] sm:$0xff]  ;;  %v1731_v41 = vsel %vm5340_vm1, %v4679_v21, %v1716_v62  ;;  %vm5345_vm1 = vmmov %vm5344_vm2  ;;  %v1765_v29 = vpack.c.bf16 %v1735_v53, %v1734_v12  ;;  %v1745_v26 = vrot.slane %v4676_v2, 1  ;;  %vm5353_vm14 = vcmp.lt.s32.totalorder %v4041_v13, 1 }
 0x19f   : > { %3500 = vmatprep.mubr.msk.bf16.mxu1 %vm5341_vm7, %v4687_v30  ;;  %v4700_v42 = vpack.c.bf16 %v4671_v36, %v4690_v16  ;;  %v1732_v22 = vsel %vm4121_vm3, %v1731_v41, 0.0  ;;  %vm5346_vm7 = vmmov %vm5342_vm13  ;;  %v1722_v10 = vrot.slane %v4690_v16, 7  ;;  %v1746_v62 = vrot.slane %v4690_v16, 1 }
 0x1a0   : > { %v1764_v15 = vpack.c.bf16 %v1733_v35, %v1732_v22  ;;  %v4721_v61 = vsel %vm5346_vm7, %v1720_v8, %v1721_v31  ;;  %vm5347_vm13 = vmmov %vm5346_vm7  ;;  %v2055_v40 = vsel %vm4138_vm4, %v4714_v51, 0.0 }
 0x1a1   : > { %3501 = vmatmul.mubr.msk.bf16.gmra.mrb[4].mxu1 %vm5344_vm2, %v4700_v42  ;;  %v4737_v33 = vsel %vm5347_vm13, %v1719_v37, %v1720_v8  ;;  %v1737_v9 = vsel %vm4206_vm8, %v4721_v61, 0.0  ;;  %vm5349_vm2 = vnez %v5261_v63  ;;  %vm5352_vm13 = vcmask 64512  }
 0x1a2   : > { %3506 = vmatprep.mubr.msk.bf16.mxu1 %vm5345_vm1, %v1764_v15  ;;  %v1736_v52 = vsel %vm5349_vm2, %v4737_v33, 0.0  ;;  %vm5350_vm1 = vcmp.lt.s32.totalorder %v4041_v13, 7  ;;  %v4772_v4 = vsel %vm5353_vm14, %v1722_v10, %v4679_v21  ;;  %vm5355_vm9 = vmmov %vm5352_vm13  ;;  %v2393_v8 = vsel %vm4138_vm4, %v4709_v20, 0.0 }
 0x1a3   : > { %v4757_v55 = vsel %vm5350_vm1, %v4740_v5, %v4724_v11  ;;  %vm5351_vm7 = vmmov %vm5350_vm1  ;;  %v1766_v58 = vpack.c.bf16 %v1737_v9, %v1736_v52  ;;  %v2394_v15 = vsel %vm4172_vm5, %v4737_v33, 0.0  ;;  %v2395_v12 = vsel %vm4178_vm6, %v4721_v61, 0.0 }
 0x1a4   : > { %v4761_v49 = vsel %vm5351_vm7, %v1743_v7, %v1744_v60  ;;  %vm5354_vm1 = vmmov %vm5353_vm14  ;;  %v4781_v41 = vsel %vm5351_vm7, %v4724_v11, %v1743_v7  ;;  %vm5357_vm14 = vnez %v5271_v46  ;;  %v1739_v53 = vsel %vm4255_vm11, %v4772_v4, 0.0 }
 0x1a5   : > { %v4776_v23 = vsel %vm5354_vm1, %v1721_v31, %v1722_v10  ;;  %v1757_v22 = vsel %vm5357_vm14, %v4757_v55, 0.0  ;;  %v2391_v31 = vsel %vm5354_vm1, %v5243_v28, %v1718_v24  ;;  %v4816_v9 = vpack.c.bf16 %v2395_v12, %v2394_v15 }
 0x1a6   : > { %v2392_v35 = vsel %vm4121_vm3, %v2391_v31, 0.0  ;;  %v1738_v24 = vsel %vm4249_vm10, %v4776_v23, 0.0  ;;  %v2397_v52 = vsel %vm4206_vm8, %v4772_v4, 0.0  ;;  %vm5361_vm1 = vnez %v5269_v34 }
 0x1a7   : > { %v4814_v10 = vpack.c.bf16 %v2393_v8, %v2392_v35  ;;  %v1767_v31 = vpack.c.bf16 %v1739_v53, %v1738_v24  ;;  %v2416_v8 = vsel %vm5361_vm1, %v4781_v41, 0.0  ;;  %v4854_v53 = vld [vmem:[#allocation3 + $0x48] sm:$0xff]  ;;  %v2057_v38 = vsel %vm4178_vm6, %v4737_v33, 0.0 }
 0x1a8   : > { %v2058_v51 = vsel %vm5349_vm2, %v4721_v61, 0.0  ;;  %v2060_v63 = vsel %vm4249_vm10, %v4772_v4, 0.0  ;;  %v2180_v61 = vpack.c.bf16 %v4650_v50, %v4644_v59  ;;  %v3221_v4 = vld [vmem:[%s5194_s5 + $0x18] sm:$0xf]  ;;  %v2079_v50 = vsel %vm5357_vm14, %v4781_v41, 0.0 }
 0x1a9   : > { %3507 = vmatmul.mubr.msk.bf16.vlgmr.msra.gmra.mrb[0].mxu1 %vm5352_vm13, %v1765_v29  ;;  %vm5356_vm13 = vmmov %vm5351_vm7  ;;  %vm5358_vm7 = vcmask 1043456   ;;  %v2521_v14 = vpack.c.bf16 %v4726_v25, %v4854_v53 }
 0x1aa   : > { %3515 = vmatpush3.bf16.msra.mxu1 %v1955_v44  ;;  %3510 = vmatprep.mubr.msk.bf16.mxu1 %vm5355_vm9, %v1766_v58  ;;  %v1754_v37 = vsel %vm5356_vm13, %v1740_v48, %v4740_v5  ;;  %vm5359_vm9 = vmmov %vm5356_vm13  ;;  %v2396_v44 = vsel %vm5349_vm2, %v4776_v23, 0.0 }
 0x1ab   : > { %3737 = vmatprep.subr.msk.bf16.mxu1 %vm5358_vm7, %v3206_v32  ;;  %v4820_v7 = vsel %vm5359_vm9, %v1745_v26, %v1746_v62  ;;  %vm5360_vm13 = vmmov %vm5359_vm9  ;;  %v4832_v58 = vpack.c.bf16 %v2397_v52, %v2396_v44  ;;  %v1756_v35 = vsel %vm5361_vm1, %v1754_v37, 0.0  ;;  %vm5362_vm7 = vnez %v5273_v18 }
 0x1ac   : > { %v4824_v29 = vsel %vm5360_vm13, %v1744_v60, %v1745_v26  ;;  %v2417_v60 = vsel %vm5357_vm14, %v4761_v49, 0.0  ;;  %v1936_v26 = vpack.c.bf16 %v1757_v22, %v1756_v35  ;;  %vm5363_vm9 = vnez %v5275_v3  ;;  %v3226_v3 = vld [vmem:[%s5194_s5 + $0x1c] sm:$0xf] }
 0x1ad   : > { %v4842_v15 = vpack.c.bf16 %v2417_v60, %v2416_v8  ;;  %v2418_v12 = vsel %vm5362_vm7, %v4824_v29, 0.0  ;;  %v2419_v24 = vsel %vm5363_vm9, %v4820_v7, 0.0  ;;  %vm5364_vm13 = vcmask 64512  }
 0x1ae   : > { %v4851_v37 = vpack.c.bf16 %v2419_v24, %v2418_v12  ;;  %vm5365_vm1 = vmmov %vm5364_vm13  ;;  %v1758_v22 = vsel %vm5362_vm7, %v4781_v41, 0.0  ;;  %v1759_v44 = vsel %vm5363_vm9, %v4761_v49, 0.0  ;;  %v1761_v52 = vsel %vm5308_vm15, %v4820_v7, 0.0  ;;  %v3211_v24 = vld [vmem:[%s5194_s5 + $0x10] sm:$0xf] }
 0x1af   : > { %v4869_v35 = vrot.slane %v4671_v36, 1  ;;  %v1937_v8 = vpack.c.bf16 %v1759_v44, %v1758_v22  ;;  %vm5367_vm7 = vcmp.lt.s32.totalorder %v4041_v13, 7  ;;  %vm5368_vm15 = vmmov %vm5364_vm13  ;;  %vm5390_vm14 = vnez %v5273_v18 }
 0x1b1   : > { %3511 = vmatmul.mubr.msk.bf16.gmra.mrb[4].mxu1 %vm5364_vm13, %v1767_v31  ;;  %v4866_v31 = vrot.slane %v4854_v53, 7  ;;  %v4882_v28 = vsel %vm5367_vm7, %v1746_v62, %v4869_v35 }
 0x1b2   : > { %3516 = vmatprep.mubr.msk.bf16.mxu1 %vm5365_vm1, %v1936_v26  ;;  %vm5366_vm1 = vcmask 1043456   ;;  %v1760_v26 = vsel %vm5307_vm12, %v4824_v29, 0.0  ;;  %vm5370_vm12 = vmmov %vm5367_vm7  ;;  %v1762_v62 = vsel %vm4426_vm0, %v4882_v28, 0.0  ;;  %vm5373_vm7 = vcmask 64512  }
 0x1b3   : > { %v2105_v60 = vsel %vm5366_vm1, %v3206_v32, 0  ;;  %v1938_v12 = vpack.c.bf16 %v1761_v52, %v1760_v26  ;;  %vm5369_vm1 = vcmp.lt.s32.totalorder %v4041_v13, 1  ;;  %v1755_v22 = vsel %vm5370_vm12, %v4869_v35, %v1740_v48  ;;  %vm5374_vm12 = vmmov %vm5373_vm7 }
 0x1b4   : > { %v2053_v32 = vsel %vm5369_vm1, %v4866_v31, %v4664_v47  ;;  %v2056_v48 = vsel %vm4172_vm5, %v4709_v20, 0.0  ;;  %vm5376_vm4 = vmmov %vm5373_vm7 }
 0x1b5   : > { %v2054_v44 = vsel %vm4121_vm3, %v2053_v32, 0.0  ;;  %v2087_v26 = vpack.c.bf16 %v2057_v38, %v2056_v48  ;;  %vm5377_vm5 = vmmov %vm5369_vm1 }
 0x1b6   : > { %v2086_v47 = vpack.c.bf16 %v2055_v40, %v2054_v44  ;;  %v2046_v57 = vsel %vm5377_vm5, %v4679_v21, %v4866_v31  ;;  %vm5378_vm6 = vmmov %vm5376_vm4  ;;  %v2181_v21 = vpack.c.bf16 %v4674_v19, %v4652_v1  ;;  %v2183_v1 = vpack.c.bf16 %v4854_v53, %v4671_v36 }
 0x1b7   : > { %v2061_v0 = vsel %vm4255_vm11, %v2046_v57, 0.0  ;;  %vm5380_vm2 = vmmov %vm5376_vm4  ;;  %v2080_v36 = vsel %vm5390_vm14, %v4761_v49, 0.0 }
 0x1b8   : > { %v2089_v20 = vpack.c.bf16 %v2061_v0, %v2060_v63  ;;  %vm5381_vm1 = vmmov %vm5380_vm2 }
 0x1b9   : > { %3517 = vmatmul.mubr.msk.bf16.vlgmr.msra.gmra.mrb[0].mxu1 %vm5364_vm13, %v1937_v8  ;;  %vm5371_vm13 = vcmask 1043456   ;;  %vm5386_vm5 = vmmov %vm5381_vm1 }
 0x1ba   : > { %3525 = vmatpush3.bf16.msra.mxu1 %v2105_v60  ;;  %3520 = vmatprep.mubr.msk.bf16.mxu1 %vm5368_vm15, %v1938_v12  ;;  %vm5372_vm15 = vnez %v5288_v39  ;;  %v2059_v60 = vsel %vm4206_vm8, %v4776_v23, 0.0  ;;  %vm5375_vm3 = vmmov %vm5371_vm13  ;;  %v2182_v23 = vpack.c.bf16 %v4690_v16, %v4676_v2  ;;  %v2081_v2 = vsel %vm5363_vm9, %v4824_v29, 0.0  ;;  %v3808_v39 = vld [vmem:[%s5196_s7] sm:$0xff]  }
 0x1bb   : > { %3738 = vmatprep.subr.msk.bf16.mxu1 %vm5371_vm13, %v3211_v24  ;;  %v1763_v52 = vsel %vm5372_vm15, %v1755_v22, 0.0  ;;  %v2199_v43 = vsel %vm5375_vm3, %v3211_v24, 0  ;;  %v2088_v12 = vpack.c.bf16 %v2059_v60, %v2058_v51  ;;  %vm5379_vm8 = vmmov %vm5375_vm3  ;;  %v2069_v16 = vrot.slane %v4854_v53, 1  ;;  %v5057_v53 = vld [vmem:[%s352_s18 + $0x10] sm:$0xff]   ;;  %3594 = vmatprep.subr.bf16.mxu0 %v3808_v39 }
 0x1bc   : > { %v1939_v8 = vpack.c.bf16 %v1763_v52, %v1762_v62  ;;  %vm5382_vm13 = vmmov %vm5375_vm3  ;;  %v5401_v22 = vrot.slane %v4726_v25, 7  ;;  %3595 = vmatpush3.bf16.msra.mxu0 %v3808_v39 }
 0x1bd   : > { %v2293_v33 = vsel %vm5382_vm13, %v3216_v56, 0  ;;  %vm5392_vm9 = vmmov %vm5386_vm5  ;;  %vm5393_vm13 = vcmp.lt.s32.totalorder %v4041_v13, 7  ;;  %3596 = vmatprep.subr.bf16.mxu0 %v3809_v27 }
 0x1c0   : > { %3597 = vmatpush3.bf16.msra.mxu0 %v3809_v27 }
 0x1c1   : > { %3521 = vmatmul.mubr.msk.bf16.gmra.mrb[4].mxu1 %vm5373_vm7, %v1939_v8  ;;  %vm5383_vm7 = vmmov %vm5381_vm1 }
 0x1c2   : > { %3526 = vmatprep.mubr.msk.bf16.mxu1 %vm5374_vm12, %v2086_v47  ;;  %vm5384_vm12 = vmmov %vm5381_vm1 }
 0x1c9   : > { %3527 = vmatmul.mubr.msk.bf16.vlgmr.msra.gmra.mrb[0].mxu1 %vm5376_vm4, %v2087_v26  ;;  %vm5385_vm4 = vnez %v5269_v34 }
 0x1ca   : > { %3535 = vmatpush3.bf16.msra.mxu1 %v2199_v43  ;;  %3530 = vmatprep.mubr.msk.bf16.mxu1 %vm5378_vm6, %v2088_v12  ;;  %v2078_v59 = vsel %vm5385_vm4, %v4757_v55, 0.0  ;;  %vm5387_vm6 = vmmov %vm5381_vm1  ;;  %v2275_v55 = vpack.c.bf16 %v2081_v2, %v2080_v36 }
 0x1cb   : > { %3739 = vmatprep.subr.msk.bf16.mxu1 %vm5379_vm8, %v3216_v56  ;;  %v2274_v19 = vpack.c.bf16 %v2079_v50, %v2078_v59  ;;  %vm5388_vm8 = vnez %v5278_v6  ;;  %vm5397_vm4 = vmmov %vm5386_vm5 }
 0x1cc   : > { %v2082_v34 = vsel %vm5388_vm8, %v4820_v7, 0.0  ;;  %v2070_v7 = vsel %vm5393_vm13, %v4869_v35, %v2069_v16  ;;  %vm5400_vm14 = vmmov %vm5397_vm4  ;;  %v2420_v17 = vsel %vm5388_vm8, %v4882_v28, 0.0 }
 0x1cd   : > { %v2084_v18 = vsel %vm4426_vm0, %v2070_v7, 0.0 }
 0x1d1   : > { %3531 = vmatmul.mubr.msk.bf16.gmra.mrb[4].mxu1 %vm5380_vm2, %v2089_v20  ;;  %vm5389_vm2 = vnez %v5281_v45  ;;  %v5046_v45 = vld [vmem:[%s352_s18] sm:$0xff]  }
 0x1d2   : > { %3536 = vmatprep.mubr.msk.bf16.mxu1 %vm5381_vm1, %v2180_v61  ;;  %v2083_v46 = vsel %vm5389_vm2, %v4882_v28, 0.0  ;;  %vm5391_vm1 = vmmov %vm5375_vm3 }
 0x1d3   : > { %v2443_v41 = vsel %vm5391_vm1, %v3221_v4, 0  ;;  %v2276_v24 = vpack.c.bf16 %v2083_v46, %v2082_v34 }
 0x1d9   : > { %3537 = vmatmul.mubr.msk.bf16.vlgmr.msra.gmra.mrb[0].mxu1 %vm5383_vm7, %v2181_v21  ;;  %vm5394_vm7 = vmmov %vm5393_vm13 }
 0x1da   : > { %3545 = vmatpush3.bf16.msra.mxu1 %v2293_v33  ;;  %3540 = vmatprep.mubr.msk.bf16.mxu1 %vm5384_vm12, %v2182_v23  ;;  %v2077_v29 = vsel %vm5394_vm7, %v2069_v16, %v4740_v5  ;;  %vm5395_vm12 = vmmov %vm5386_vm5  ;;  %v3231_v5 = vld [vmem:[%s5194_s5 + $0x20] sm:$0xf] }
 0x1db   : > { %3740 = vmatprep.subr.msk.bf16.mxu1 %vm5375_vm3, %v3221_v4  ;;  %vm5396_vm3 = vmmov %vm5391_vm1  ;;  %v2085_v49 = vsel %vm5372_vm15, %v2077_v29, 0.0 }
 0x1dc   : > { %v2277_v32 = vpack.c.bf16 %v2085_v49, %v2084_v18  ;;  %vm5404_vm13 = vmmov %vm5396_vm3 }
 0x1dd   : > { %vm5405_vm7 = vmmov %vm5397_vm4 }
 0x1e1   : > { %3541 = vmatmul.mubr.msk.bf16.gmra.mrb[4].mxu1 %vm5386_vm5, %v2183_v1  ;;  %vm5398_vm5 = vmmov %vm5397_vm4  ;;  %v5415_v1 = vld [vmem:[#allocation8_spill] sm:$0xff] }
 0x1e2   : > { %3546 = vmatprep.mubr.msk.bf16.mxu1 %vm5387_vm6, %v2274_v19  ;;  %vm5399_vm6 = vmmov %vm5391_vm1  ;;  %vm5402_vm1 = vcmp.lt.s32.totalorder %v4041_v13, 1  ;;  %v5416_v19 = vunpack.c.l.bf16 %v5415_v1 }
 0x1e3   : > { %v2537_v35 = vsel %vm5399_vm6, %v3226_v3, 0  ;;  %v2384_v62 = vsel %vm5402_vm1, %v4866_v31, %v5401_v22  ;;  %vm5410_vm6 = vmmov %vm5397_vm4 }
 0x1e4   : > { %v2399_v44 = vsel %vm4255_vm11, %v2384_v62, 0.0  ;;  %vm5408_vm11 = vmmov %vm5397_vm4 }
 0x1e5   : > { %vm5412_vm1 = vmmov %vm5397_vm4 }
 0x1e9   : > { %3547 = vmatmul.mubr.msk.bf16.vlgmr.msra.gmra.mrb[0].mxu1 %vm5392_vm9, %v2275_v55  ;;  %vm5403_vm9 = vmmov %vm5397_vm4 }
 0x1ea   : > { %3555 = vmatpush3.bf16.msra.mxu1 %v2443_v41  ;;  %3550 = vmatprep.mubr.msk.bf16.mxu1 %vm5395_vm12, %v2276_v24  ;;  %vm5406_vm12 = vmmov %vm5397_vm4  ;;  %v5419_v24 = vunpack.c.h.bf16 %v5415_v1  ;;  %v2953_v1 = vunpack.c.l.bf16 %v5057_v53 }
 0x1eb   : > { %3741 = vmatprep.subr.msk.bf16.mxu1 %vm5396_vm3, %v3226_v3 }
 0x1f1   : > { %3551 = vmatmul.mubr.msk.bf16.gmra.mrb[4].mxu1 %vm5397_vm4, %v2277_v32 }
 0x1f2   : > { %3556 = vmatprep.mubr.msk.bf16.mxu1 %vm5398_vm5, %v4814_v10  ;;  %v2398_v10 = vsel %vm4249_vm10, %v2046_v57, 0.0  ;;  %vm5407_vm10 = vmmov %vm5397_vm4 }
 0x1f3   : > { %v2427_v52 = vpack.c.bf16 %v2399_v44, %v2398_v10  ;;  %vm5409_vm5 = vmmov %vm5397_vm4  ;;  %v5421_v44 = vld [vmem:[#allocation10_spill] sm:$0xff] }
 0x1f9   : > { %3557 = vmatmul.mubr.msk.bf16.vlgmr.msra.gmra.mrb[0].mxu1 %vm5400_vm14, %v4816_v9  ;;  %v2631_v9 = vsel %vm5396_vm3, %v3231_v5, 0  ;;  %vm5411_vm14 = vcmp.lt.s32.totalorder %v4041_v13, 7  ;;  %v5063_v13 = vld [vmem:[%s352_s18 + $0x18] sm:$0xff]  }
 0x1fa   : > { %3565 = vmatpush3.bf16.msra.mxu1 %v2537_v35  ;;  %3560 = vmatprep.mubr.msk.bf16.mxu1 %vm5403_vm9, %v4832_v58  ;;  %v3803_v58 = vld [vmem:[%s5195_s6] sm:$0xff]   ;;  %vm5413_vm8 = vmmov %vm5411_vm14 }
 0x1fb   : > { %3742 = vmatprep.subr.msk.bf16.mxu1 %vm5404_vm13, %v3231_v5  ;;  %vm5414_vm9 = vmmov %vm5412_vm1 }
 0x201   : > { %3561 = vmatmul.mubr.msk.bf16.gmra.mrb[4].mxu1 %vm5405_vm7, %v2427_v52  ;;  %v5422_v52 = vunpack.c.l.bf16 %v5421_v44 }
 0x202   : > { %3566 = vmatprep.mubr.msk.bf16.mxu1 %vm5406_vm12, %v4658_v54  ;;  %v2421_v54 = vsel %vm5389_vm2, %v2070_v7, 0.0  ;;  %vm2750_vm2 = vcmask 130048  }
 0x203   : > { %v2614_v31 = vpack.c.bf16 %v2421_v54, %v2420_v17 }
 0x209   : > { %3567 = vmatmul.mubr.msk.bf16.vlgmr.msra.gmra.mrb[0].mxu1 %vm5397_vm4, %v4687_v30  ;;  %v2407_v30 = vrot.slane %v4726_v25, 1 }
 0x20a   : > { %3575 = vmatpush3.bf16.msra.mxu1 %v2631_v9  ;;  %3570 = vmatprep.mubr.msk.bf16.mxu1 %vm5407_vm10, %v4700_v42 }
 0x20b   : > { %3584 = vmatprep.subr.bf16.mxu1 %v3803_v58  ;;  %v2408_v42 = vsel %vm5411_vm14, %v2069_v16, %v2407_v30  ;;  %v2415_v6 = vsel %vm5413_vm8, %v2407_v30, %v4724_v11  ;;  %v5417_v16 = vld [vmem:[#allocation7_spill] sm:$0xff] }
 0x20c   : > { %v2422_v25 = vsel %vm4426_vm0, %v2408_v42, 0.0  ;;  %v2423_v28 = vsel %vm5372_vm15, %v2415_v6, 0.0  ;;  %v5418_v36 = vunpack.c.l.bf16 %v5417_v16  ;;  %v5420_v18 = vunpack.c.h.bf16 %v5417_v16 }
 0x20d   : > { %vm5425_vm0 = vcmask 261120  }
 0x20e   : > { %vm5427_vm15 = vmmov %vm5425_vm0 }
 0x20f   : > { %vm5429_vm13 = vmmov %vm5425_vm0 }
 0x210   : > { %vm5430_vm7 = vmmov %vm5425_vm0 }
 0x211   : > { %3571 = vmatmul.mubr.msk.bf16.gmra.mrb[4].mxu1 %vm5408_vm11, %v2521_v14  ;;  %v5423_v14 = vld [vmem:[#allocation9_spill] sm:$0xff] }
 0x212   : > { %3576 = vmatprep.mubr.msk.bf16.mxu1 %vm5409_vm5, %v4842_v15  ;;  %v2615_v15 = vpack.c.bf16 %v2423_v28, %v2422_v25  ;;  %v5424_v17 = vunpack.c.l.bf16 %v5423_v14  ;;  %v5428_v28 = vunpack.c.h.bf16 %v5423_v14 }
 0x219   : > { %3577 = vmatmul.mubr.msk.bf16.vlgmr.msra.gmra.mrb[0].mxu1 %vm5410_vm6, %v4851_v37  ;;  %v5055_v37 = vld [vmem:[%s352_s18 + $0x8] sm:$0xff]  }
 0x21a   : > { %3585 = vmatpush3.bf16.msra.mxu1 %v3803_v58  ;;  %3580 = vmatprep.mubr.msk.bf16.mxu1 %vm5412_vm1, %v2614_v31  ;;  %v5426_v31 = vunpack.c.h.bf16 %v5421_v44 }
 0x221   : > { %3581 = vmatmul.mubr.msk.bf16.gmra.mrb[4].mxu1 %vm5414_vm9, %v2615_v15 }
 0x222   : > { %3586 = vmatprep.mubr.msk.bf16.mxu1 %vm2750_vm2, %v5046_v45 }
 0x229   : > { %3587 = vmatmul.mubr.msk.bf16.vlgmr.msra.gmra.mrb[8].mxu1 %vm2750_vm2, %v5055_v37 }
 0x22a   : > { %3590 = vmatprep.mubr.msk.bf16.mxu1 %vm2750_vm2, %v5057_v53 }
 0x231   : > { %3591 = vmatmul.mubr.msk.bf16.gmra.mrb[12].mxu1 %vm2750_vm2, %v5063_v13 }
 0x2ec   : > { %v3578_v11 = vpop.f32.mrb[0].mxu1 }
 0x2ed   : > { %v2667_v8 = vpop.f32.mrb[1].mxu1  ;;  %v2708_v2 = vmul.f32 %v3578_v11, %v5416_v19  ;;  %v2956_v19 = vunpack.c.h.bf16 %v5063_v13 }
 0x2ee   : > { %v3579_v40 = vpop.f32.mrb[2].mxu1  ;;  %v2706_v55 = vmul.f32 %v5418_v36, %v2667_v8 }
 0x2ef   : > { %v2670_v47 = vpop.f32.mrb[3].mxu1  ;;  %v2709_v3 = vmul.f32 %v3579_v40, %v5419_v24 }
 0x2f0   : > { %v2707_v49 = vmul.f32 %v5420_v18, %v2670_v47  ;;  %v2946_v18 = vld [vmem:[%s5099_s10 + $0x28] sm:$0xff] }
 0x2f4   : > { %v3582_v48 = vpop.f32.mrb[4].mxu1 }
 0x2f5   : > { %v2683_v38 = vpop.f32.mrb[5].mxu1  ;;  %v2712_v9 = vmul.f32 %v3582_v48, %v5422_v52  ;;  %v2951_v48 = vunpack.c.l.bf16 %v5055_v37 }
 0x2f6   : > { %v3583_v60 = vpop.f32.mrb[6].mxu1  ;;  %v2710_v54 = vmul.f32 %v5424_v17, %v2683_v38  ;;  %v2949_v38 = vunpack.c.l.bf16 %v5046_v45 }
 0x2f7   : > { %v2686_v26 = vpop.f32.mrb[7].mxu1  ;;  %v2713_v42 = vmul.f32 %v3583_v60, %v5426_v31  ;;  %v2952_v60 = vunpack.c.h.bf16 %v5055_v37  ;;  %v2955_v37 = vunpack.c.l.bf16 %v5063_v13 }
 0x2f8   : > { %v2711_v15 = vmul.f32 %v5428_v28, %v2686_v26 }
 0x2fc   : > { %v3588_v43 = vpop.f32.mrb[8].mxu1 }
 0x2fd   : > { %v2806_v51 = vadd.f32 1e-05, %v3588_v43  ;;  %v2797_v12 = vpop.f32.mrb[9].mxu1  ;;  %v2943_v43 = vld [vmem:[%s5099_s10 + $0x10] sm:$0xff] }
 0x2fe   : > { %v2798_v56 = vadd.f32 1e-05, %v2797_v12  ;;  %v3589_v57 = vpop.f32.mrb[10].mxu1 }
 0x2ff   : > { %3830 = vrcp.f32 %v2806_v51  ;;  %v2809_v63 = vadd.f32 1e-05, %v3589_v57  ;;  %v2800_v0 = vpop.f32.mrb[11].mxu1  ;;  %v2950_v51 = vunpack.c.h.bf16 %v5046_v45  ;;  %v2941_v57 = vld [vmem:[%s5099_s10] sm:$0xff] }
 0x300   : > { %3832 = vrcp.f32 %v2798_v56  ;;  %v2801_v20 = vadd.f32 1e-05, %v2800_v0 }
 0x301   : > { %3834 = vrcp.f32 %v2809_v63 }
 0x302   : > { %3836 = vrcp.f32 %v2801_v20  ;;  %v2944_v20 = vld [vmem:[%s5099_s10 + $0x18] sm:$0xff] }
 0x304   : > { %v3592_v61 = vpop.f32.mrb[12].mxu1 }
 0x305   : > { %v2822_v21 = vadd.f32 1e-05, %v3592_v61  ;;  %v2813_v33 = vpop.f32.mrb[13].mxu1 }
 0x306   : > { %v2814_v23 = vadd.f32 1e-05, %v2813_v33  ;;  %v3593_v4 = vpop.f32.mrb[14].mxu1 }
 0x307   : > { %3838 = vrcp.f32 %v2822_v21  ;;  %v2825_v59 = vadd.f32 1e-05, %v3593_v4  ;;  %v2816_v50 = vpop.f32.mrb[15].mxu1 }
 0x308   : > { %3840 = vrcp.f32 %v2814_v23  ;;  %v2817_v34 = vadd.f32 1e-05, %v2816_v50  ;;  %v2942_v23 = vld [vmem:[%s5099_s10 + $0x8] sm:$0xff] }
 0x309   : > { %v3831_v46 = vpop.eup %3830  ;;  %3842 = vrcp.f32 %v2825_v59 }
 0x30a   : > { %v3833_v41 = vpop.eup %3832  ;;  %v2838_v7 = vmul.f32 %v3831_v46, %v2708_v2  ;;  %3844 = vrcp.f32 %v2817_v34  ;;  %v2947_v34 = vld [vmem:[%s5099_s10 + $0x30] sm:$0xff]  ;;  %v2954_v46 = vunpack.c.h.bf16 %v5057_v53 }
 0x30b   : > { %v3835_v29 = vpop.eup %3834  ;;  %v2836_v32 = vmul.f32 %v3833_v41, %v2706_v55  ;;  %v2945_v55 = vld [vmem:[%s5099_s10 + $0x20] sm:$0xff] }
 0x30c   : > { %v3837_v35 = vpop.eup %3836  ;;  %v2839_v5 = vmul.f32 %v3835_v29, %v2709_v3  ;;  %v2948_v3 = vld [vmem:[%s5099_s10 + $0x38] sm:$0xff] }
 0x30d   : > { %v2837_v22 = vmul.f32 %v3837_v35, %v2707_v49 }
 0x30e   : > { %v2845_v62 = vpack.c.bf16 %v2839_v5, %v2838_v7 }
 0x30f   : > { %v2844_v10 = vpack.c.bf16 %v2837_v22, %v2836_v32 }
 0x311   : > { %v3839_v58 = vpop.eup %3838  ;;  %3598 = vmatprep.mubr.msk.bf16.mxu0 %vm5425_vm0, %v2844_v10 }
 0x312   : > { %v3841_v30 = vpop.eup %3840  ;;  %3599 = vmatmul.mubr.msk.bf16.vlgmr.msra.gmra.mrb[8].mxu0 %vm5427_vm15, %v2845_v62  ;;  %v2842_v6 = vmul.f32 %v3839_v58, %v2712_v9 }
 0x313   : > { %v3843_v25 = vpop.eup %3842  ;;  %v2840_v39 = vmul.f32 %v3841_v30, %v2710_v54 }
 0x314   : > { %v3845_v27 = vpop.eup %3844  ;;  %v2843_v11 = vmul.f32 %v3843_v25, %v2713_v42 }
 0x315   : > { %v2841_v8 = vmul.f32 %v3845_v27, %v2711_v15 }
 0x316   : > { %v2847_v40 = vpack.c.bf16 %v2843_v11, %v2842_v6 }
 0x317   : > { %v2846_v47 = vpack.c.bf16 %v2841_v8, %v2840_v39 }
 0x319   : > { %3602 = vmatprep.mubr.msk.bf16.mxu0 %vm5429_vm13, %v2846_v47 }
 0x31a   : > { %3603 = vmatmul.mubr.msk.bf16.gmra.mrb[12].mxu0 %vm5430_vm7, %v2847_v40 }
 0x3e5   : > { %v3600_v26 = vpop.f32.mrb[8].mxu0 }
 0x3e6   : > { %v2959_v12 = vmul.f32 %v3600_v26, %v2951_v48  ;;  %v2910_v56 = vpop.f32.mrb[9].mxu0 }
 0x3e7   : > { %v2957_v63 = vmul.f32 %v2949_v38, %v2910_v56  ;;  %v3601_v0 = vpop.f32.mrb[10].mxu0 }
 0x3e8   : > { %v2967_v61 = vadd.f32 %v2959_v12, %v2943_v43  ;;  %v2960_v21 = vmul.f32 %v3601_v0, %v2952_v60  ;;  %v2913_v33 = vpop.f32.mrb[11].mxu0 }
 0x3e9   : > { %v2965_v4 = vadd.f32 %v2957_v63, %v2941_v57  ;;  %v2958_v59 = vmul.f32 %v2950_v51, %v2913_v33 }
 0x3ea   : > { %2975 = vst.msk [vmem:[%s5111_s19 + $0x10] sm:$0xff] %vm2750_vm2, %v2967_v61  ;;  %v2968_v45 = vadd.f32 %v2960_v21, %v2944_v20 }
 0x3eb   : > { %2973 = vst.msk [vmem:[%s5111_s19] sm:$0xff] %vm2750_vm2, %v2965_v4  ;;  %v2966_v50 = vadd.f32 %v2958_v59, %v2942_v23 }
 0x3ec   : > { %2976 = vst.msk [vmem:[%s5111_s19 + $0x18] sm:$0xff] %vm2750_vm2, %v2968_v45 }
 0x3ed   : > { %2974 = vst.msk [vmem:[%s5111_s19 + $0x8] sm:$0xff] %vm2750_vm2, %v2966_v50  ;;  %v3604_v2 = vpop.f32.mrb[12].mxu0 }
 0x3ee   : > { %v2963_v16 = vmul.f32 %v3604_v2, %v2955_v37  ;;  %v2926_v36 = vpop.f32.mrb[13].mxu0 }
 0x3ef   : > { %v2961_v41 = vmul.f32 %v2953_v1, %v2926_v36  ;;  %v3605_v24 = vpop.f32.mrb[14].mxu0 }
 0x3f0   : > { %v2971_v13 = vadd.f32 %v2963_v16, %v2947_v34  ;;  %v2964_v7 = vmul.f32 %v3605_v24, %v2956_v19  ;;  %v2929_v29 = vpop.f32.mrb[15].mxu0 }
 0x3f1   : > { %v2969_v49 = vadd.f32 %v2961_v41, %v2945_v55  ;;  %v2962_v32 = vmul.f32 %v2954_v46, %v2929_v29 }
 0x3f2   : > { %2979 = vst.msk [vmem:[%s5111_s19 + $0x30] sm:$0xff] %vm2750_vm2, %v2971_v13  ;;  %v2972_v53 = vadd.f32 %v2964_v7, %v2948_v3 }
 0x3f3   : > { %2977 = vst.msk [vmem:[%s5111_s19 + $0x20] sm:$0xff] %vm2750_vm2, %v2969_v49  ;;  %v2970_v35 = vadd.f32 %v2962_v32, %v2946_v18 }
 0x3f4   : > { %2980 = vst.msk [vmem:[%s5111_s19 + $0x38] sm:$0xff] %vm2750_vm2, %v2972_v53 }
 0x3f5   : > { %2978 = vst.msk [vmem:[%s5111_s19 + $0x28] sm:$0xff] %vm2750_vm2, %v2970_v35 }
 0x3f6   : > { %3859 = shalt.err (!%p3856_p3)
}
 0x3f7   : > { %s3860_s23 = scalar_lea.hbm %s5136_s20, 1024  ;;  %s3864_s19 = scalar_lea.hbm %s5197_s8, 2048 }
 0x3f8   : > { %p3861_p4 = scmp.ne.s32.totalorder %s5136_s20, %s3860_s23  ;;  %p3865_p9 = scmp.lt.u32.totalorder %s5136_s20, %s5197_s8 }
 0x3f9   : > { %p3866_p10 = scmp.lt.u32.totalorder %s3864_s19, %s3860_s23  ;;  %p3868_p12 = scmp.lt.u32.totalorder %s3860_s23, %s5136_s20 }
 0x3fa   : > { %p3862_p7 = pnand %p3861_p4, %p3997_p5 }
 0x3fb   : > { %p3867_p11 = por %p3866_p10, %p3865_p9 }
 0x3fc   : > { %p3863_p8 = pneg %p3862_p7 }
 0x3fd   : > { %p3869_p13 = por %p3868_p12, %p3867_p11 }
 0x3ff   : > { %p3870_p0 = pnand %p3869_p13, %p3863_p8 }
 0x401   : > { %3873 = shalt.err (!%p3870_p0)
}
 0x402   : > { %s3912_s24 = smov 128   ;;  %s3913_s21 = smov 8  }
 0x403   : > { %3743 = dma.vmem_to_hbm [thread:$0]  (%p3997_p5), %s5138_s17, 1024, %s5136_s20, %s5148_s9, %s3912_s24, %s3912_s24, %s3913_s21  }
 0x404 PF: > { %p3749_p1 = scmp.ge.s32.totalorder %s3908_s30, 2  ;;  %s3010_s22 = sand.u32 1, %s3896_s27  }
 0x405   : > { %s3011_s25 = scalar_lea.sflag [#allocation5], %s3010_s22 }
 0x406   : > { %p3746_p2 = pnand %p3749_p1, %p4001_p6 }
 0x408   : > { %3891 = dma.done.wait (!%p3746_p2), %s3011_s25, 1024  }
 0x409   : > { %3893 = vsyncadd (!%p3746_p2), %s3011_s25, 4294966272  ;;  %p18_p3 = scmp.ge.s32.totalorder %s3984_s11, 4   ;;  %s5431_s27 = smov %s3900_s28 }
 0x40a   : > { %s5432_s28 = smov %s3904_s29  ;;  %s5433_s29 = smov %s3995_s14 }
 0x40b   : > { %s5434_s30 = smov %s3984_s11  ;;  %20 = sbr.rel (!%p18_p3) target bundleno = 3 (0x3), region = 112 }
 0x412   :  { %3016 = vsyncpa [#allocation5], 1 }
 0x413   :  { %3018 = vsyncpa [#allocation5 + $0x1], 1 }

</bundles_post_ra>
